<compile_context>
chip_gen: v7x
topology: tpu7x:2x2x1
jax: 0.10.0
libtpu: 0.0.40
codegen_flags: <defaults>
</compile_context>

<pallas_src>
import math

import jax
import jax.numpy as jnp
from jax.experimental import pallas as pl
from jax.experimental.pallas import tpu as pltpu

EPS = 1e-5
LANE = 128


def _round_up(n, m):
    return ((n + m - 1) // m) * m


def _pad2d(a, rows, cols, value=0.0):
    return jnp.pad(a, ((0, rows - a.shape[0]), (0, cols - a.shape[1])),
                   constant_values=value)


def mlp_kernel(x_ref, w_in_ref, w1_ref, w2_ref, w_out_ref, vec_ref, b_out_ref, out_ref):
    """Fused Linear->ReLU->[Linear->BN->ReLU]x2->Linear.

    vec_ref rows (f32, shape (8, hid_p) == one vreg tile):
      0: b_in   1: b1   2: g1   3: bt1   4: b2   5: g2   6: bt2   7: spare (zeros)
    """
    # fcin + ReLU (bf16 operands on the MXU, f32 accumulation).
    h = jnp.dot(x_ref[...], w_in_ref[...],
                preferred_element_type=jnp.float32) + vec_ref[0:1, :]
    h = jnp.maximum(h, 0.0).astype(jnp.bfloat16)

    def linear_bn_relu(h_bf16, w_ref, b, g, bt):
        z = jnp.dot(h_bf16, w_ref[...], preferred_element_type=jnp.float32) + b
        # BatchNorm1d (training-mode batch stats): fused single-pass sums, all f32.
        n = jnp.float32(z.shape[0])
        s1 = jnp.sum(z, axis=0, keepdims=True)
        s2 = jnp.sum(z * z, axis=0, keepdims=True)
        mu = s1 / n
        var = jnp.maximum(s2 / n - mu * mu, 0.0)  # guard tiny negative cancellation
        # Folded normalize + affine: one mul + one add per element.
        scale = g * jax.lax.rsqrt(var + EPS)
        shift = bt - mu * scale
        zn = z * scale + shift
        return jnp.maximum(zn, 0.0).astype(jnp.bfloat16)

    h = linear_bn_relu(h, w1_ref, vec_ref[1:2, :], vec_ref[2:3, :], vec_ref[3:4, :])
    h = linear_bn_relu(h, w2_ref, vec_ref[4:5, :], vec_ref[5:6, :], vec_ref[6:7, :])

    # fcout (no activation); lane-dense padded store.
    out_ref[...] = (jnp.dot(h, w_out_ref[...],
                            preferred_element_type=jnp.float32) + b_out_ref[...])


def init_linear(key, in_dim, out_dim):
    """PyTorch-style Linear init (uniform +-1/sqrt(fan_in)).
    W already transposed to (in_dim, out_dim), bias as (1, out_dim)."""
    kw, kb = jax.random.split(key)
    bound = 1.0 / math.sqrt(in_dim)
    w = jax.random.uniform(kw, (in_dim, out_dim), jnp.float32, -bound, bound)
    b = jax.random.uniform(kb, (1, out_dim), jnp.float32, -bound, bound)
    return w, b


def make_mlp_params(key, input_dim, output_dim, hidden_dim=64):
    """Returns (raw_params, packed_params).

    raw_params    : unpadded f32 params (for the pure-JAX reference).
    packed_params : pre-padded, pre-cast kernel operands. Padding + bf16 casts happen
                    exactly once here, not per forward call. Invariant: padded weight
                    rows/cols, biases and betas are exactly zero, so padded BN lanes
                    stay identically 0 inside the kernel.
    """
    k0, k1, k2, k3 = jax.random.split(key, 4)
    w_in, b_in = init_linear(k0, input_dim, hidden_dim)
    w1, b1 = init_linear(k1, hidden_dim, hidden_dim)
    w2, b2 = init_linear(k2, hidden_dim, hidden_dim)
    w_out, b_out = init_linear(k3, hidden_dim, output_dim)
    g1 = jnp.ones((1, hidden_dim), jnp.float32)
    bt1 = jnp.zeros((1, hidden_dim), jnp.float32)
    g2 = jnp.ones((1, hidden_dim), jnp.float32)
    bt2 = jnp.zeros((1, hidden_dim), jnp.float32)
    raw = (w_in, b_in, w1, b1, g1, bt1, w2, b2, g2, bt2, w_out, b_out)

    # Lane-dense padded dims (multiples of 128). Note: do NOT pad hidden to 256 on
    # v6e/v7x (would double wasted FLOPs); pick MXU-native widths only if the model grows.
    in_p = _round_up(input_dim, LANE)
    hid_p = _round_up(hidden_dim, LANE)
    out_p = _round_up(output_dim, LANE)

    w_in_p = _pad2d(w_in, in_p, hid_p).astype(jnp.bfloat16)
    w1_p = _pad2d(w1, hid_p, hid_p).astype(jnp.bfloat16)
    w2_p = _pad2d(w2, hid_p, hid_p).astype(jnp.bfloat16)
    w_out_p = _pad2d(w_out, hid_p, out_p).astype(jnp.bfloat16)

    # Pack the seven (1, hid_p) f32 vectors into one (8, hid_p) block (one vreg tile).
    vecs = jnp.concatenate([
        _pad2d(b_in, 1, hid_p),
        _pad2d(b1, 1, hid_p),
        _pad2d(g1, 1, hid_p, 1.0),
        _pad2d(bt1, 1, hid_p),
        _pad2d(b2, 1, hid_p),
        _pad2d(g2, 1, hid_p, 1.0),
        _pad2d(bt2, 1, hid_p),
        jnp.zeros((1, hid_p), jnp.float32),
    ], axis=0)
    b_out_p = _pad2d(b_out, 1, out_p)

    packed = (w_in_p, w1_p, w2_p, w_out_p, vecs, b_out_p)
    return raw, packed


def mlp_forward(x, packed, out_dim):
    w_in_p, w1_p, w2_p, w_out_p, vecs, b_out_p = packed
    batch = x.shape[0]
    in_p, hid_p = w_in_p.shape
    out_p = w_out_p.shape[1]

    # Only the activation is padded / cast per call; params were packed at init.
    x_p = _pad2d(x, batch, in_p).astype(jnp.bfloat16)

    flops = 2 * batch * (in_p * hid_p + 2 * hid_p * hid_p + hid_p * out_p)
    bytes_accessed = int(
        x_p.size * 2
        + sum(int(p.size) * p.dtype.itemsize for p in packed)
        + batch * out_p * 4)

    out = pl.pallas_call(
        mlp_kernel,
        out_shape=jax.ShapeDtypeStruct((batch, out_p), jnp.float32),
        in_specs=[pl.BlockSpec(memory_space=pltpu.MemorySpace.VMEM)] * 7,
        out_specs=pl.BlockSpec(memory_space=pltpu.MemorySpace.VMEM),
        cost_estimate=pl.CostEstimate(flops=flops,
                                      transcendentals=2 * hid_p,
                                      bytes_accessed=bytes_accessed),
    )(x_p, w_in_p, w1_p, w2_p, w_out_p, vecs, b_out_p)

    # Drop the padded output lanes.
    return out[:, :out_dim]


def mlp_reference(x, raw):
    """Pure-JAX reference mirroring the kernel's numerics (bf16 MXU operands, f32 acc,
    fused one-pass BN stats, folded scale/shift)."""
    (w_in, b_in, w1, b1, g1, bt1, w2, b2, g2, bt2, w_out, b_out) = raw

    def mm(a, w):
        return jnp.dot(a.astype(jnp.bfloat16), w.astype(jnp.bfloat16),
                       preferred_element_type=jnp.float32)

    h = jnp.maximum(mm(x, w_in) + b_in, 0.0)
    for (w, b, g, bt) in ((w1, b1, g1, bt1), (w2, b2, g2, bt2)):
        z = mm(h, w) + b
        n = jnp.float32(z.shape[0])
        mu = jnp.sum(z, axis=0, keepdims=True) / n
        var = jnp.maximum(jnp.sum(z * z, axis=0, keepdims=True) / n - mu * mu, 0.0)
        scale = g * jax.lax.rsqrt(var + EPS)
        shift = bt - mu * scale
        h = jnp.maximum(z * scale + shift, 0.0)
    return mm(h, w_out) + b_out


if __name__ == "__main__":
    # batch >= 128 so the MXU row dimension is filled and per-call overhead is amortized.
    batch, input_dim, output_dim, hidden_dim = 256, 16, 8, 64

    key = jax.random.PRNGKey(0)
    kx, kp = jax.random.split(key)
    x = jax.random.normal(kx, (batch, input_dim), jnp.float32)
    raw_params, packed_params = make_mlp_params(kp, input_dim, output_dim, hidden_dim)

    fwd = jax.jit(mlp_forward, static_argnums=(2,))
    out = jax.block_until_ready(fwd(x, packed_params, output_dim))

    ref = mlp_reference(x, raw_params)
    assert out.shape == (batch, output_dim)
    assert jnp.allclose(out, ref, atol=2e-3, rtol=2e-3), "mismatch vs. JAX reference"

    print("KERNEL_OK")
</pallas_src>

<mosaic_0001>
module attributes {stable_mosaic.version = 11 : i64} {
  func.func @mlp_kernel(%arg0: memref<256x128xbf16, #tpu.memory_space<vmem>>, %arg1: memref<128x128xbf16, #tpu.memory_space<vmem>>, %arg2: memref<128x128xbf16, #tpu.memory_space<vmem>>, %arg3: memref<128x128xbf16, #tpu.memory_space<vmem>>, %arg4: memref<128x128xbf16, #tpu.memory_space<vmem>>, %arg5: memref<8x128xf32, #tpu.memory_space<vmem>>, %arg6: memref<1x128xf32, #tpu.memory_space<vmem>>, %arg7: memref<256x128xf32, #tpu.memory_space<vmem>>) attributes {dimension_semantics = [], scalar_prefetch = 0 : i64, scratch_operands = 0 : i64, tpu.core_type = #tpu.core_type<tc>} {
    %c0 = arith.constant 0 : index
    %c0_0 = arith.constant 0 : index
    %0 = vector.load %arg0[%c0, %c0_0] : memref<256x128xbf16, #tpu.memory_space<vmem>>, vector<256x128xbf16>
    %c0_1 = arith.constant 0 : index
    %c0_2 = arith.constant 0 : index
    %1 = vector.load %arg1[%c0_1, %c0_2] : memref<128x128xbf16, #tpu.memory_space<vmem>>, vector<128x128xbf16>
    %cst = arith.constant dense<0.000000e+00> : vector<256x128xf32>
    %2 = tpu.matmul %0, %1, %cst {dimension_numbers = #tpu.dot_dimension_numbers<[1], [0], [0], [1], [0, 0, 1, 1], [], []>} : vector<256x128xbf16>, vector<128x128xbf16>, vector<256x128xf32> -> vector<256x128xf32>
    %c0_3 = arith.constant 0 : index
    %c0_4 = arith.constant 0 : index
    %3 = vector.load %arg5[%c0_3, %c0_4] : memref<8x128xf32, #tpu.memory_space<vmem>>, vector<1x128xf32>
    %4 = vector.broadcast %3 : vector<1x128xf32> to vector<256x128xf32>
    %5 = arith.addf %2, %4 : vector<256x128xf32>
    %cst_5 = arith.constant 0.000000e+00 : f32
    %6 = vector.broadcast %cst_5 : f32 to vector<256x128xf32>
    %7 = arith.maximumf %5, %6 : vector<256x128xf32>
    %8 = arith.truncf %7 : vector<256x128xf32> to vector<256x128xbf16>
    %c1 = arith.constant 1 : index
    %c0_6 = arith.constant 0 : index
    %9 = vector.load %arg5[%c1, %c0_6] : memref<8x128xf32, #tpu.memory_space<vmem>>, vector<1x128xf32>
    %c2 = arith.constant 2 : index
    %c0_7 = arith.constant 0 : index
    %10 = vector.load %arg5[%c2, %c0_7] : memref<8x128xf32, #tpu.memory_space<vmem>>, vector<1x128xf32>
    %c3 = arith.constant 3 : index
    %c0_8 = arith.constant 0 : index
    %11 = vector.load %arg5[%c3, %c0_8] : memref<8x128xf32, #tpu.memory_space<vmem>>, vector<1x128xf32>
    %c0_9 = arith.constant 0 : index
    %c0_10 = arith.constant 0 : index
    %12 = vector.load %arg2[%c0_9, %c0_10] : memref<128x128xbf16, #tpu.memory_space<vmem>>, vector<128x128xbf16>
    %cst_11 = arith.constant dense<0.000000e+00> : vector<256x128xf32>
    %13 = tpu.matmul %8, %12, %cst_11 {dimension_numbers = #tpu.dot_dimension_numbers<[1], [0], [0], [1], [0, 0, 1, 1], [], []>} : vector<256x128xbf16>, vector<128x128xbf16>, vector<256x128xf32> -> vector<256x128xf32>
    %14 = vector.broadcast %9 : vector<1x128xf32> to vector<256x128xf32>
    %15 = arith.addf %13, %14 : vector<256x128xf32>
    %cst_12 = arith.constant dense<0.000000e+00> : vector<128xf32>
    %16 = vector.multi_reduction <add>, %15, %cst_12 [0] : vector<256x128xf32> to vector<128xf32>
    %17 = vector.shape_cast %16 : vector<128xf32> to vector<1x128xf32>
    %18 = arith.mulf %15, %15 : vector<256x128xf32>
    %cst_13 = arith.constant dense<0.000000e+00> : vector<128xf32>
    %19 = vector.multi_reduction <add>, %18, %cst_13 [0] : vector<256x128xf32> to vector<128xf32>
    %20 = vector.shape_cast %19 : vector<128xf32> to vector<1x128xf32>
    %cst_14 = arith.constant 2.560000e+02 : f32
    %21 = vector.broadcast %cst_14 : f32 to vector<1x128xf32>
    %22 = arith.divf %17, %21 : vector<1x128xf32>
    %cst_15 = arith.constant 2.560000e+02 : f32
    %23 = vector.broadcast %cst_15 : f32 to vector<1x128xf32>
    %24 = arith.divf %20, %23 : vector<1x128xf32>
    %25 = arith.mulf %22, %22 : vector<1x128xf32>
    %26 = arith.subf %24, %25 : vector<1x128xf32>
    %cst_16 = arith.constant 0.000000e+00 : f32
    %27 = vector.broadcast %cst_16 : f32 to vector<1x128xf32>
    %28 = arith.maximumf %26, %27 : vector<1x128xf32>
    %cst_17 = arith.constant 9.99999974E-6 : f32
    %29 = vector.broadcast %cst_17 : f32 to vector<1x128xf32>
    %30 = arith.addf %28, %29 : vector<1x128xf32>
    %31 = math.rsqrt %30 : vector<1x128xf32>
    %32 = arith.mulf %10, %31 : vector<1x128xf32>
    %33 = arith.mulf %22, %32 : vector<1x128xf32>
    %34 = arith.subf %11, %33 : vector<1x128xf32>
    %35 = vector.broadcast %32 : vector<1x128xf32> to vector<256x128xf32>
    %36 = arith.mulf %15, %35 : vector<256x128xf32>
    %37 = vector.broadcast %34 : vector<1x128xf32> to vector<256x128xf32>
    %38 = arith.addf %36, %37 : vector<256x128xf32>
    %cst_18 = arith.constant 0.000000e+00 : f32
    %39 = vector.broadcast %cst_18 : f32 to vector<256x128xf32>
    %40 = arith.maximumf %38, %39 : vector<256x128xf32>
    %41 = arith.truncf %40 : vector<256x128xf32> to vector<256x128xbf16>
    %c4 = arith.constant 4 : index
    %c0_19 = arith.constant 0 : index
    %42 = vector.load %arg5[%c4, %c0_19] : memref<8x128xf32, #tpu.memory_space<vmem>>, vector<1x128xf32>
    %c5 = arith.constant 5 : index
    %c0_20 = arith.constant 0 : index
    %43 = vector.load %arg5[%c5, %c0_20] : memref<8x128xf32, #tpu.memory_space<vmem>>, vector<1x128xf32>
    %c6 = arith.constant 6 : index
    %c0_21 = arith.constant 0 : index
    %44 = vector.load %arg5[%c6, %c0_21] : memref<8x128xf32, #tpu.memory_space<vmem>>, vector<1x128xf32>
    %c0_22 = arith.constant 0 : index
    %c0_23 = arith.constant 0 : index
    %45 = vector.load %arg3[%c0_22, %c0_23] : memref<128x128xbf16, #tpu.memory_space<vmem>>, vector<128x128xbf16>
    %cst_24 = arith.constant dense<0.000000e+00> : vector<256x128xf32>
    %46 = tpu.matmul %41, %45, %cst_24 {dimension_numbers = #tpu.dot_dimension_numbers<[1], [0], [0], [1], [0, 0, 1, 1], [], []>} : vector<256x128xbf16>, vector<128x128xbf16>, vector<256x128xf32> -> vector<256x128xf32>
    %47 = vector.broadcast %42 : vector<1x128xf32> to vector<256x128xf32>
    %48 = arith.addf %46, %47 : vector<256x128xf32>
    %cst_25 = arith.constant dense<0.000000e+00> : vector<128xf32>
    %49 = vector.multi_reduction <add>, %48, %cst_25 [0] : vector<256x128xf32> to vector<128xf32>
    %50 = vector.shape_cast %49 : vector<128xf32> to vector<1x128xf32>
    %51 = arith.mulf %48, %48 : vector<256x128xf32>
    %cst_26 = arith.constant dense<0.000000e+00> : vector<128xf32>
    %52 = vector.multi_reduction <add>, %51, %cst_26 [0] : vector<256x128xf32> to vector<128xf32>
    %53 = vector.shape_cast %52 : vector<128xf32> to vector<1x128xf32>
    %cst_27 = arith.constant 2.560000e+02 : f32
    %54 = vector.broadcast %cst_27 : f32 to vector<1x128xf32>
    %55 = arith.divf %50, %54 : vector<1x128xf32>
    %cst_28 = arith.constant 2.560000e+02 : f32
    %56 = vector.broadcast %cst_28 : f32 to vector<1x128xf32>
    %57 = arith.divf %53, %56 : vector<1x128xf32>
    %58 = arith.mulf %55, %55 : vector<1x128xf32>
    %59 = arith.subf %57, %58 : vector<1x128xf32>
    %cst_29 = arith.constant 0.000000e+00 : f32
    %60 = vector.broadcast %cst_29 : f32 to vector<1x128xf32>
    %61 = arith.maximumf %59, %60 : vector<1x128xf32>
    %cst_30 = arith.constant 9.99999974E-6 : f32
    %62 = vector.broadcast %cst_30 : f32 to vector<1x128xf32>
    %63 = arith.addf %61, %62 : vector<1x128xf32>
    %64 = math.rsqrt %63 : vector<1x128xf32>
    %65 = arith.mulf %43, %64 : vector<1x128xf32>
    %66 = arith.mulf %55, %65 : vector<1x128xf32>
    %67 = arith.subf %44, %66 : vector<1x128xf32>
    %68 = vector.broadcast %65 : vector<1x128xf32> to vector<256x128xf32>
    %69 = arith.mulf %48, %68 : vector<256x128xf32>
    %70 = vector.broadcast %67 : vector<1x128xf32> to vector<256x128xf32>
    %71 = arith.addf %69, %70 : vector<256x128xf32>
    %cst_31 = arith.constant 0.000000e+00 : f32
    %72 = vector.broadcast %cst_31 : f32 to vector<256x128xf32>
    %73 = arith.maximumf %71, %72 : vector<256x128xf32>
    %74 = arith.truncf %73 : vector<256x128xf32> to vector<256x128xbf16>
    %c0_32 = arith.constant 0 : index
    %c0_33 = arith.constant 0 : index
    %75 = vector.load %arg4[%c0_32, %c0_33] : memref<128x128xbf16, #tpu.memory_space<vmem>>, vector<128x128xbf16>
    %cst_34 = arith.constant dense<0.000000e+00> : vector<256x128xf32>
    %76 = tpu.matmul %74, %75, %cst_34 {dimension_numbers = #tpu.dot_dimension_numbers<[1], [0], [0], [1], [0, 0, 1, 1], [], []>} : vector<256x128xbf16>, vector<128x128xbf16>, vector<256x128xf32> -> vector<256x128xf32>
    %c0_35 = arith.constant 0 : index
    %c0_36 = arith.constant 0 : index
    %77 = vector.load %arg6[%c0_35, %c0_36] : memref<1x128xf32, #tpu.memory_space<vmem>>, vector<1x128xf32>
    %78 = vector.broadcast %77 : vector<1x128xf32> to vector<256x128xf32>
    %79 = arith.addf %76, %78 : vector<256x128xf32>
    %c0_37 = arith.constant 0 : index
    %c0_38 = arith.constant 0 : index
    %80 = vector.load %arg7[%c0_37, %c0_38] : memref<256x128xf32, #tpu.memory_space<vmem>>, vector<256x128xf32>
    tpu.vector_store %arg7[%c0_37, %c0_38], %79 {strides = array<i32>} : memref<256x128xf32, #tpu.memory_space<vmem>>, vector<256x128xf32>,
    return
  }
}

</mosaic_0001>

<bundles_post_ra>
// kernel: mlp_forward.1
= control target key start
LH: loop header
LB: loop body
LE: loop exit
PB: predicated region body
PF: predicated region fallthrough
CT: control target
= control target key end

     0   :  { %s2970_s1 = inlined_call_operand.vmem [shape: bf16[128,128], index: 1, kind: input, shape index: {}]   ;;  %s2971_s0 = inlined_call_operand.vmem [shape: bf16[256,128], index: 0, kind: input, shape index: {}]   ;;  %s2972_s2 = inlined_call_operand.vmem [shape: bf16[128,128], index: 2, kind: input, shape index: {}]   ;;  %s2973_s5 = inlined_call_operand.vmem [shape: f32[8,128], index: 5, kind: input, shape index: {}]   ;;  %s2974_s3 = inlined_call_operand.vmem [shape: bf16[128,128], index: 3, kind: input, shape index: {}]   ;;  %s2975_s4 = inlined_call_operand.vmem [shape: bf16[128,128], index: 4, kind: input, shape index: {}]   ;;  %s2976_s6 = inlined_call_operand.vmem [shape: f32[1,128], index: 6, kind: input, shape index: {}]   ;;  %s2977_s7 = inlined_call_operand.vmem [shape: f32[256,128], index: 7, kind: output, shape index: {}]  }
   0x1   :  { %v1978_v0 = vld [vmem:[%s2970_s1] sm:$0xff]   ;;  %v1979_v1 = vld [vmem:[%s2970_s1 + $0x8] sm:$0xff]   ;;  %v1980_v2 = vld [vmem:[%s2970_s1 + $0x10] sm:$0xff]  }
   0x2   :  { %1786 = vmatprep.subr.bf16.mxu0 %v1978_v0  ;;  %v1981_v3 = vld [vmem:[%s2970_s1 + $0x18] sm:$0xff]   ;;  %v1986_v4 = vld [vmem:[%s2971_s0] sm:$0xff]   ;;  %v1983_v6 = vld [vmem:[%s2970_s1 + $0x28] sm:$0xff]  }
   0x3   :  { %1787 = vmatpush3.bf16.msra.mxu0 %v1978_v0  ;;  %1802 = vmatprep.mubr.bf16.mxu0 %v1986_v4  ;;  %v1982_v5 = vld [vmem:[%s2970_s1 + $0x20] sm:$0xff]   ;;  %v1984_v7 = vld [vmem:[%s2970_s1 + $0x30] sm:$0xff]   ;;  %v1985_v8 = vld [vmem:[%s2970_s1 + $0x38] sm:$0xff]  }
   0x4   :  { %1788 = vmatprep.subr.bf16.mxu0 %v1979_v1  ;;  %v2002_v9 = vld [vmem:[%s2972_s2] sm:$0xff]   ;;  %v2003_v10 = vld [vmem:[%s2972_s2 + $0x8] sm:$0xff]   ;;  %v2004_v11 = vld [vmem:[%s2972_s2 + $0x10] sm:$0xff]  }
   0x5   :  { %1834 = vmatprep.subr.bf16.mxu1 %v2002_v9  ;;  %v1987_v12 = vld [vmem:[%s2971_s0 + $0x8] sm:$0xff]   ;;  %v1988_v13 = vld [vmem:[%s2971_s0 + $0x10] sm:$0xff]   ;;  %v2005_v14 = vld [vmem:[%s2972_s2 + $0x18] sm:$0xff]  }
   0x6   :  { %1835 = vmatpush3.bf16.msra.mxu1 %v2002_v9  ;;  %v2006_v15 = vld [vmem:[%s2972_s2 + $0x20] sm:$0xff]   ;;  %v1989_v16 = vld [vmem:[%s2971_s0 + $0x18] sm:$0xff]   ;;  %v2007_v18 = vld [vmem:[%s2972_s2 + $0x28] sm:$0xff]  }
   0x7   :  { %1789 = vmatpush3.bf16.msra.mxu0 %v1979_v1  ;;  %1836 = vmatprep.subr.bf16.mxu1 %v2003_v10  ;;  %v1990_v17 = vld [vmem:[%s2971_s0 + $0x20] sm:$0xff]   ;;  %v1991_v19 = vld [vmem:[%s2971_s0 + $0x28] sm:$0xff]   ;;  %v1992_v20 = vld [vmem:[%s2971_s0 + $0x30] sm:$0xff]  }
   0x8   :  { %1790 = vmatprep.subr.bf16.mxu0 %v1980_v2  ;;  %v1993_v21 = vld [vmem:[%s2971_s0 + $0x38] sm:$0xff]   ;;  %v1994_v22 = vld [vmem:[%s2971_s0 + $0x40] sm:$0xff]   ;;  %v1995_v23 = vld [vmem:[%s2971_s0 + $0x48] sm:$0xff]  }
   0x9   :  { %v1996_v24 = vld [vmem:[%s2971_s0 + $0x50] sm:$0xff]   ;;  %v1997_v25 = vld [vmem:[%s2971_s0 + $0x58] sm:$0xff]   ;;  %v1998_v26 = vld [vmem:[%s2971_s0 + $0x60] sm:$0xff]  }
   0xa   :  { %1837 = vmatpush3.bf16.msra.mxu1 %v2003_v10  ;;  %v1999_v27 = vld [vmem:[%s2971_s0 + $0x68] sm:$0xff]   ;;  %v2000_v28 = vld [vmem:[%s2971_s0 + $0x70] sm:$0xff]   ;;  %v2001_v29 = vld [vmem:[%s2971_s0 + $0x78] sm:$0xff]  }
   0xb   :  { %1791 = vmatpush3.bf16.msra.mxu0 %v1980_v2  ;;  %1838 = vmatprep.subr.bf16.mxu1 %v2004_v11  ;;  %v2008_v30 = vld [vmem:[%s2972_s2 + $0x30] sm:$0xff]   ;;  %v2009_v31 = vld [vmem:[%s2972_s2 + $0x38] sm:$0xff]   ;;  %v2169_v32 = vld [vmem:[%s2973_s5] ss:$0 sm:$0xff] }
   0xc   :  { %1792 = vmatprep.subr.bf16.mxu0 %v1981_v3 }
   0xe   :  { %1839 = vmatpush3.bf16.msra.mxu1 %v2004_v11 }
   0xf   :  { %1793 = vmatpush3.bf16.msra.mxu0 %v1981_v3  ;;  %1840 = vmatprep.subr.bf16.mxu1 %v2005_v14 }
  0x10   :  { %1794 = vmatprep.subr.bf16.mxu0 %v1982_v5 }
  0x12   :  { %1841 = vmatpush3.bf16.msra.mxu1 %v2005_v14 }
  0x13   :  { %1795 = vmatpush3.bf16.msra.mxu0 %v1982_v5  ;;  %1842 = vmatprep.subr.bf16.mxu1 %v2006_v15 }
  0x14   :  { %1796 = vmatprep.subr.bf16.mxu0 %v1983_v6 }
  0x16   :  { %1843 = vmatpush3.bf16.msra.mxu1 %v2006_v15 }
  0x17   :  { %1797 = vmatpush3.bf16.msra.mxu0 %v1983_v6  ;;  %1844 = vmatprep.subr.bf16.mxu1 %v2007_v18 }
  0x18   :  { %1798 = vmatprep.subr.bf16.mxu0 %v1984_v7 }
  0x1a   :  { %1845 = vmatpush3.bf16.msra.mxu1 %v2007_v18 }
  0x1b   :  { %1799 = vmatpush3.bf16.msra.mxu0 %v1984_v7  ;;  %1846 = vmatprep.subr.bf16.mxu1 %v2008_v30 }
  0x1c   :  { %1800 = vmatprep.subr.bf16.mxu0 %v1985_v8 }
  0x1e   :  { %1847 = vmatpush3.bf16.msra.mxu1 %v2008_v30 }
  0x1f   :  { %1801 = vmatpush3.bf16.msra.mxu0 %v1985_v8  ;;  %1848 = vmatprep.subr.bf16.mxu1 %v2009_v31 }
  0x22   :  { %1803 = vmatmul.mubr.bf16.vlgmr.msra.gmra.mrb[0].mxu0 %v1987_v12  ;;  %1849 = vmatpush3.bf16.msra.mxu1 %v2009_v31 }
  0x23   :  { %1806 = vmatprep.mubr.bf16.mxu0 %v1988_v13 }
  0x2a   :  { %1807 = vmatmul.mubr.bf16.gmra.mrb[4].mxu0 %v1989_v16 }
  0x2b   :  { %1810 = vmatprep.mubr.bf16.mxu0 %v1990_v17 }
  0x32   :  { %1811 = vmatmul.mubr.bf16.gmra.mrb[8].mxu0 %v1991_v19 }
  0x33   :  { %1814 = vmatprep.mubr.bf16.mxu0 %v1992_v20 }
  0x3a   :  { %1815 = vmatmul.mubr.bf16.gmra.mrb[12].mxu0 %v1993_v21 }
  0x3b   :  { %1818 = vmatprep.mubr.bf16.mxu0 %v1994_v22 }
  0x42   :  { %1819 = vmatmul.mubr.bf16.gmra.mrb[16].mxu0 %v1995_v23 }
  0x43   :  { %1822 = vmatprep.mubr.bf16.mxu0 %v1996_v24 }
  0x4a   :  { %1823 = vmatmul.mubr.bf16.gmra.mrb[20].mxu0 %v1997_v25 }
  0x4b   :  { %1826 = vmatprep.mubr.bf16.mxu0 %v1998_v26 }
  0x52   :  { %1827 = vmatmul.mubr.bf16.gmra.mrb[24].mxu0 %v1999_v27 }
  0x53   :  { %1830 = vmatprep.mubr.bf16.mxu0 %v2000_v28 }
  0x5a   :  { %1831 = vmatmul.mubr.bf16.gmra.mrb[28].mxu0 %v2001_v29 }
  0xf5   :  { %v1804_v33 = vpop.f32.mrb[0].mxu0 }
  0xf6   :  { %v267_v34 = vadd.f32 %v1804_v33, %v2169_v32  ;;  %v258_v35 = vpop.f32.mrb[1].mxu0 }
  0xf7   :  { %v259_v36 = vadd.f32 %v2169_v32, %v258_v35  ;;  %v1805_v37 = vpop.f32.mrb[2].mxu0 }
  0xf8   :  { %v270_v38 = vadd.f32 %v1805_v37, %v2169_v32  ;;  %v261_v39 = vpop.f32.mrb[3].mxu0  ;;  %v387_v41 = vmax.f32 %v267_v34, 0.0 }
  0xf9   :  { %v262_v40 = vadd.f32 %v2169_v32, %v261_v39  ;;  %v385_v43 = vmax.f32 %v259_v36, 0.0 }
  0xfa   :  { %v388_v42 = vmax.f32 %v270_v38, 0.0 }
  0xfb   :  { %v386_v44 = vmax.f32 %v262_v40, 0.0 }
  0xfc   :  { %v418_v45 = vpack.c.bf16 %v388_v42, %v387_v41 }
  0xfd   :  { %v1808_v46 = vpop.f32.mrb[4].mxu0  ;;  %v417_v47 = vpack.c.bf16 %v386_v44, %v385_v43 }
  0xfe   :  { %v283_v48 = vadd.f32 %v1808_v46, %v2169_v32  ;;  %v274_v49 = vpop.f32.mrb[5].mxu0 }
  0xff   :  { %v275_v50 = vadd.f32 %v2169_v32, %v274_v49  ;;  %v1809_v51 = vpop.f32.mrb[6].mxu0  ;;  %1850 = vmatprep.mubr.bf16.mxu1 %v417_v47 }
 0x100   :  { %v286_v52 = vadd.f32 %v1809_v51, %v2169_v32  ;;  %v277_v53 = vpop.f32.mrb[7].mxu0  ;;  %1851 = vmatmul.mubr.bf16.vlgmr.msra.gmra.mrb[0].mxu1 %v418_v45  ;;  %v391_v55 = vmax.f32 %v283_v48, 0.0 }
 0x101   :  { %v278_v54 = vadd.f32 %v2169_v32, %v277_v53  ;;  %v389_v57 = vmax.f32 %v275_v50, 0.0 }
 0x102   :  { %v392_v56 = vmax.f32 %v286_v52, 0.0 }
 0x103   :  { %v390_v58 = vmax.f32 %v278_v54, 0.0 }
 0x104   :  { %v420_v59 = vpack.c.bf16 %v392_v56, %v391_v55 }
 0x105   :  { %v419_v60 = vpack.c.bf16 %v390_v58, %v389_v57  ;;  %v1812_v61 = vpop.f32.mrb[8].mxu0 }
 0x106   :  { %v299_v62 = vadd.f32 %v1812_v61, %v2169_v32  ;;  %v290_v63 = vpop.f32.mrb[9].mxu0 }
 0x107   :  { %v291_v0 = vadd.f32 %v2169_v32, %v290_v63  ;;  %v1813_v1 = vpop.f32.mrb[10].mxu0  ;;  %1854 = vmatprep.mubr.bf16.mxu1 %v419_v60 }
 0x108   :  { %v302_v2 = vadd.f32 %v1813_v1, %v2169_v32  ;;  %v293_v3 = vpop.f32.mrb[11].mxu0  ;;  %1855 = vmatmul.mubr.bf16.gmra.mrb[4].mxu1 %v420_v59  ;;  %v395_v5 = vmax.f32 %v299_v62, 0.0 }
 0x109   :  { %v294_v4 = vadd.f32 %v2169_v32, %v293_v3  ;;  %v393_v7 = vmax.f32 %v291_v0, 0.0 }
 0x10a   :  { %v396_v6 = vmax.f32 %v302_v2, 0.0 }
 0x10b   :  { %v394_v8 = vmax.f32 %v294_v4, 0.0 }
 0x10c   :  { %v422_v9 = vpack.c.bf16 %v396_v6, %v395_v5 }
 0x10d   :  { %v421_v10 = vpack.c.bf16 %v394_v8, %v393_v7  ;;  %v1816_v11 = vpop.f32.mrb[12].mxu0 }
 0x10e   :  { %v315_v12 = vadd.f32 %v1816_v11, %v2169_v32  ;;  %v306_v13 = vpop.f32.mrb[13].mxu0 }
 0x10f   :  { %v307_v14 = vadd.f32 %v2169_v32, %v306_v13  ;;  %v1817_v15 = vpop.f32.mrb[14].mxu0  ;;  %1858 = vmatprep.mubr.bf16.mxu1 %v421_v10 }
 0x110   :  { %v318_v16 = vadd.f32 %v1817_v15, %v2169_v32  ;;  %v309_v17 = vpop.f32.mrb[15].mxu0  ;;  %1859 = vmatmul.mubr.bf16.gmra.mrb[8].mxu1 %v422_v9  ;;  %v399_v19 = vmax.f32 %v315_v12, 0.0 }
 0x111   :  { %v310_v18 = vadd.f32 %v2169_v32, %v309_v17  ;;  %v397_v21 = vmax.f32 %v307_v14, 0.0 }
 0x112   :  { %v400_v20 = vmax.f32 %v318_v16, 0.0 }
 0x113   :  { %v398_v22 = vmax.f32 %v310_v18, 0.0  ;;  %v2010_v18 = vld [vmem:[%s2974_s3] sm:$0xff]  }
 0x114   :  { %v424_v23 = vpack.c.bf16 %v400_v20, %v399_v19  ;;  %1882 = vmatprep.subr.bf16.mxu0 %v2010_v18  ;;  %v2011_v19 = vld [vmem:[%s2974_s3 + $0x8] sm:$0xff]   ;;  %v2013_v20 = vld [vmem:[%s2974_s3 + $0x18] sm:$0xff]  }
 0x115   :  { %v423_v24 = vpack.c.bf16 %v398_v22, %v397_v21  ;;  %v1820_v25 = vpop.f32.mrb[16].mxu0  ;;  %1883 = vmatpush3.bf16.msra.mxu0 %v2010_v18  ;;  %v2014_v21 = vld [vmem:[%s2974_s3 + $0x20] sm:$0xff]   ;;  %v2015_v22 = vld [vmem:[%s2974_s3 + $0x28] sm:$0xff]  }
 0x116   :  { %v331_v26 = vadd.f32 %v1820_v25, %v2169_v32  ;;  %v322_v27 = vpop.f32.mrb[17].mxu0  ;;  %1884 = vmatprep.subr.bf16.mxu0 %v2011_v19  ;;  %v2230_v25 = vld [vmem:[%s2973_s5 + $0x1] ss:$0 sm:$0xff] }
 0x117   :  { %v323_v28 = vadd.f32 %v2169_v32, %v322_v27  ;;  %v1821_v29 = vpop.f32.mrb[18].mxu0  ;;  %1862 = vmatprep.mubr.bf16.mxu1 %v423_v24  ;;  %v2017_v24 = vld [vmem:[%s2974_s3 + $0x38] sm:$0xff]  }
 0x118   :  { %v334_v30 = vadd.f32 %v1821_v29, %v2169_v32  ;;  %v325_v31 = vpop.f32.mrb[19].mxu0  ;;  %1863 = vmatmul.mubr.bf16.gmra.mrb[12].mxu1 %v424_v23  ;;  %v403_v34 = vmax.f32 %v331_v26, 0.0  ;;  %v2016_v23 = vld [vmem:[%s2974_s3 + $0x30] sm:$0xff]  }
 0x119   :  { %v326_v33 = vadd.f32 %v2169_v32, %v325_v31  ;;  %v401_v36 = vmax.f32 %v323_v28, 0.0  ;;  %1885 = vmatpush3.bf16.msra.mxu0 %v2011_v19 }
 0x11a   :  { %v404_v35 = vmax.f32 %v334_v30, 0.0 }
 0x11b   :  { %v402_v37 = vmax.f32 %v326_v33, 0.0 }
 0x11c   :  { %v426_v38 = vpack.c.bf16 %v404_v35, %v403_v34 }
 0x11d   :  { %v425_v39 = vpack.c.bf16 %v402_v37, %v401_v36  ;;  %v1824_v40 = vpop.f32.mrb[20].mxu0 }
 0x11e   :  { %v347_v41 = vadd.f32 %v1824_v40, %v2169_v32  ;;  %v338_v42 = vpop.f32.mrb[21].mxu0 }
 0x11f   :  { %v339_v43 = vadd.f32 %v2169_v32, %v338_v42  ;;  %v1825_v44 = vpop.f32.mrb[22].mxu0  ;;  %1866 = vmatprep.mubr.bf16.mxu1 %v425_v39 }
 0x120   :  { %v350_v45 = vadd.f32 %v1825_v44, %v2169_v32  ;;  %v341_v46 = vpop.f32.mrb[23].mxu0  ;;  %1867 = vmatmul.mubr.bf16.gmra.mrb[16].mxu1 %v426_v38  ;;  %v407_v48 = vmax.f32 %v347_v41, 0.0 }
 0x121   :  { %v342_v47 = vadd.f32 %v2169_v32, %v341_v46  ;;  %v405_v50 = vmax.f32 %v339_v43, 0.0 }
 0x122   :  { %v408_v49 = vmax.f32 %v350_v45, 0.0 }
 0x123   :  { %v406_v51 = vmax.f32 %v342_v47, 0.0 }
 0x124   :  { %v428_v52 = vpack.c.bf16 %v408_v49, %v407_v48 }
 0x125   :  { %v427_v53 = vpack.c.bf16 %v406_v51, %v405_v50  ;;  %v1828_v54 = vpop.f32.mrb[24].mxu0 }
 0x126   :  { %v363_v55 = vadd.f32 %v1828_v54, %v2169_v32  ;;  %v354_v56 = vpop.f32.mrb[25].mxu0 }
 0x127   :  { %v355_v57 = vadd.f32 %v2169_v32, %v354_v56  ;;  %v1829_v58 = vpop.f32.mrb[26].mxu0  ;;  %1870 = vmatprep.mubr.bf16.mxu1 %v427_v53 }
 0x128   :  { %v366_v59 = vadd.f32 %v1829_v58, %v2169_v32  ;;  %v357_v60 = vpop.f32.mrb[27].mxu0  ;;  %1871 = vmatmul.mubr.bf16.gmra.mrb[20].mxu1 %v428_v52  ;;  %v411_v62 = vmax.f32 %v363_v55, 0.0 }
 0x129   :  { %v358_v61 = vadd.f32 %v2169_v32, %v357_v60  ;;  %v409_v0 = vmax.f32 %v355_v57, 0.0 }
 0x12a   :  { %v412_v63 = vmax.f32 %v366_v59, 0.0 }
 0x12b   :  { %v410_v1 = vmax.f32 %v358_v61, 0.0 }
 0x12c   :  { %v430_v2 = vpack.c.bf16 %v412_v63, %v411_v62 }
 0x12d   :  { %v429_v3 = vpack.c.bf16 %v410_v1, %v409_v0  ;;  %v1832_v4 = vpop.f32.mrb[28].mxu0 }
 0x12e   :  { %v379_v5 = vadd.f32 %v1832_v4, %v2169_v32  ;;  %v370_v6 = vpop.f32.mrb[29].mxu0 }
 0x12f   :  { %v371_v7 = vadd.f32 %v2169_v32, %v370_v6  ;;  %v1833_v8 = vpop.f32.mrb[30].mxu0  ;;  %1874 = vmatprep.mubr.bf16.mxu1 %v429_v3 }
 0x130   :  { %v382_v9 = vadd.f32 %v1833_v8, %v2169_v32  ;;  %v373_v10 = vpop.f32.mrb[31].mxu0  ;;  %1875 = vmatmul.mubr.bf16.gmra.mrb[24].mxu1 %v430_v2  ;;  %v415_v12 = vmax.f32 %v379_v5, 0.0 }
 0x131   :  { %v374_v11 = vadd.f32 %v2169_v32, %v373_v10  ;;  %v413_v14 = vmax.f32 %v371_v7, 0.0  ;;  %v2012_v32 = vld [vmem:[%s2974_s3 + $0x10] sm:$0xff]  }
 0x132   :  { %v416_v13 = vmax.f32 %v382_v9, 0.0  ;;  %1886 = vmatprep.subr.bf16.mxu0 %v2012_v32 }
 0x133   :  { %v414_v15 = vmax.f32 %v374_v11, 0.0  ;;  %1887 = vmatpush3.bf16.msra.mxu0 %v2012_v32 }
 0x134   :  { %v432_v16 = vpack.c.bf16 %v416_v13, %v415_v12  ;;  %1888 = vmatprep.subr.bf16.mxu0 %v2013_v20 }
 0x135   :  { %v431_v17 = vpack.c.bf16 %v414_v15, %v413_v14 }
 0x137   :  { %1878 = vmatprep.mubr.bf16.mxu1 %v431_v17  ;;  %1889 = vmatpush3.bf16.msra.mxu0 %v2013_v20 }
 0x138   :  { %1879 = vmatmul.mubr.bf16.gmra.mrb[28].mxu1 %v432_v16  ;;  %1890 = vmatprep.subr.bf16.mxu0 %v2014_v21 }
 0x13b   :  { %1891 = vmatpush3.bf16.msra.mxu0 %v2014_v21 }
 0x13c   :  { %1892 = vmatprep.subr.bf16.mxu0 %v2015_v22 }
 0x13f   :  { %1893 = vmatpush3.bf16.msra.mxu0 %v2015_v22 }
 0x140   :  { %1894 = vmatprep.subr.bf16.mxu0 %v2016_v23 }
 0x143   :  { %1895 = vmatpush3.bf16.msra.mxu0 %v2016_v23 }
 0x144   :  { %1896 = vmatprep.subr.bf16.mxu0 %v2017_v24 }
 0x147   :  { %1897 = vmatpush3.bf16.msra.mxu0 %v2017_v24 }
 0x1d3   :  { %v1852_v26 = vpop.f32.mrb[0].mxu1 }
 0x1d4   :  { %v538_v27 = vpop.f32.mrb[1].mxu1  ;;  %v2236_v31 = vadd.f32 %v1852_v26, %v2230_v25 }
 0x1d5   :  { %v2233_v28 = vadd.f32 %v2230_v25, %v538_v27  ;;  %v1853_v29 = vpop.f32.mrb[2].mxu1 }
 0x1d6   :  { %v541_v30 = vpop.f32.mrb[3].mxu1  ;;  %v2244_v35 = vadd.f32 %v1853_v29, %v2230_v25  ;;  %v704_v38 = vmul.f32 %v2236_v31, %v2236_v31 }
 0x1d7   :  { %v2239_v33 = vadd.f32 %v2230_v25, %v541_v30  ;;  %v702_v34 = vmul.f32 %v2233_v28, %v2233_v28 }
 0x1d8   :  { %v705_v43 = vmul.f32 %v2244_v35, %v2244_v35 }
 0x1d9   :  { %v665_v36 = vadd.f32 %v2239_v33, %v2233_v28  ;;  %v703_v37 = vmul.f32 %v2239_v33, %v2239_v33 }
 0x1db   :  { %v666_v39 = vadd.f32 %v665_v36, %v2236_v31  ;;  %v734_v40 = vadd.f32 %v703_v37, %v702_v34  ;;  %v1856_v41 = vpop.f32.mrb[4].mxu1 }
 0x1dc   :  { %v554_v42 = vpop.f32.mrb[5].mxu1  ;;  %v2260_v48 = vadd.f32 %v1856_v41, %v2230_v25 }
 0x1dd   :  { %v735_v44 = vadd.f32 %v734_v40, %v704_v38  ;;  %v2256_v45 = vadd.f32 %v2230_v25, %v554_v42  ;;  %v667_v46 = vadd.f32 %v666_v39, %v2244_v35  ;;  %v1857_v47 = vpop.f32.mrb[6].mxu1 }
 0x1de   :  { %v557_v49 = vpop.f32.mrb[7].mxu1  ;;  %v2269_v55 = vadd.f32 %v1857_v47, %v2230_v25  ;;  %v708_v58 = vmul.f32 %v2260_v48, %v2260_v48 }
 0x1df   :  { %v668_v50 = vadd.f32 %v667_v46, %v2256_v45  ;;  %v706_v51 = vmul.f32 %v2256_v45, %v2256_v45  ;;  %v736_v52 = vadd.f32 %v735_v44, %v705_v43  ;;  %v2266_v53 = vadd.f32 %v2230_v25, %v557_v49 }
 0x1e0   :  { %v709_v63 = vmul.f32 %v2269_v55, %v2269_v55 }
 0x1e1   :  { %v737_v54 = vadd.f32 %v736_v52, %v706_v51  ;;  %v669_v56 = vadd.f32 %v668_v50, %v2266_v53  ;;  %v707_v57 = vmul.f32 %v2266_v53, %v2266_v53 }
 0x1e3   :  { %v670_v59 = vadd.f32 %v669_v56, %v2260_v48  ;;  %v738_v60 = vadd.f32 %v737_v54, %v707_v57  ;;  %v1860_v61 = vpop.f32.mrb[8].mxu1 }
 0x1e4   :  { %v570_v62 = vpop.f32.mrb[9].mxu1  ;;  %v2284_v4 = vadd.f32 %v1860_v61, %v2230_v25 }
 0x1e5   :  { %v739_v0 = vadd.f32 %v738_v60, %v708_v58  ;;  %v2280_v1 = vadd.f32 %v2230_v25, %v570_v62  ;;  %v671_v2 = vadd.f32 %v670_v59, %v2269_v55  ;;  %v1861_v3 = vpop.f32.mrb[10].mxu1 }
 0x1e6   :  { %v573_v5 = vpop.f32.mrb[11].mxu1  ;;  %v2293_v11 = vadd.f32 %v1861_v3, %v2230_v25  ;;  %v712_v14 = vmul.f32 %v2284_v4, %v2284_v4 }
 0x1e7   :  { %v672_v6 = vadd.f32 %v671_v2, %v2280_v1  ;;  %v710_v7 = vmul.f32 %v2280_v1, %v2280_v1  ;;  %v740_v8 = vadd.f32 %v739_v0, %v709_v63  ;;  %v2290_v9 = vadd.f32 %v2230_v25, %v573_v5 }
 0x1e8   :  { %v713_v19 = vmul.f32 %v2293_v11, %v2293_v11 }
 0x1e9   :  { %v741_v10 = vadd.f32 %v740_v8, %v710_v7  ;;  %v673_v12 = vadd.f32 %v672_v6, %v2290_v9  ;;  %v711_v13 = vmul.f32 %v2290_v9, %v2290_v9 }
 0x1eb   :  { %v674_v15 = vadd.f32 %v673_v12, %v2284_v4  ;;  %v742_v16 = vadd.f32 %v741_v10, %v711_v13  ;;  %v1864_v17 = vpop.f32.mrb[12].mxu1 }
 0x1ec   :  { %v586_v18 = vpop.f32.mrb[13].mxu1  ;;  %v2308_v23 = vadd.f32 %v1864_v17, %v2230_v25 }
 0x1ed   :  { %v743_v32 = vadd.f32 %v742_v16, %v712_v14  ;;  %v2304_v20 = vadd.f32 %v2230_v25, %v586_v18  ;;  %v675_v21 = vadd.f32 %v674_v15, %v2293_v11  ;;  %v1865_v22 = vpop.f32.mrb[14].mxu1 }
 0x1ee   :  { %v589_v24 = vpop.f32.mrb[15].mxu1  ;;  %v2317_v36 = vadd.f32 %v1865_v22, %v2230_v25  ;;  %v716_v39 = vmul.f32 %v2308_v23, %v2308_v23 }
 0x1ef   :  { %v676_v26 = vadd.f32 %v675_v21, %v2304_v20  ;;  %v714_v27 = vmul.f32 %v2304_v20, %v2304_v20  ;;  %v744_v29 = vadd.f32 %v743_v32, %v713_v19  ;;  %v2314_v30 = vadd.f32 %v2230_v25, %v589_v24 }
 0x1f0   :  { %v717_v44 = vmul.f32 %v2317_v36, %v2317_v36 }
 0x1f1   :  { %v745_v34 = vadd.f32 %v744_v29, %v714_v27  ;;  %v677_v37 = vadd.f32 %v676_v26, %v2314_v30  ;;  %v715_v38 = vmul.f32 %v2314_v30, %v2314_v30 }
 0x1f3   :  { %v678_v40 = vadd.f32 %v677_v37, %v2308_v23  ;;  %v746_v41 = vadd.f32 %v745_v34, %v715_v38  ;;  %v1868_v42 = vpop.f32.mrb[16].mxu1 }
 0x1f4   :  { %v602_v43 = vpop.f32.mrb[17].mxu1  ;;  %v2332_v51 = vadd.f32 %v1868_v42, %v2230_v25 }
 0x1f5   :  { %v747_v46 = vadd.f32 %v746_v41, %v716_v39  ;;  %v2328_v47 = vadd.f32 %v2230_v25, %v602_v43  ;;  %v679_v49 = vadd.f32 %v678_v40, %v2317_v36  ;;  %v1869_v50 = vpop.f32.mrb[18].mxu1 }
 0x1f6   :  { %v605_v52 = vpop.f32.mrb[19].mxu1  ;;  %v2341_v60 = vadd.f32 %v1869_v50, %v2230_v25  ;;  %v720_v63 = vmul.f32 %v2332_v51, %v2332_v51 }
 0x1f7   :  { %v680_v54 = vadd.f32 %v679_v49, %v2328_v47  ;;  %v718_v56 = vmul.f32 %v2328_v47, %v2328_v47  ;;  %v748_v57 = vadd.f32 %v747_v46, %v717_v44  ;;  %v2338_v58 = vadd.f32 %v2230_v25, %v605_v52 }
 0x1f8   :  { %v721_v6 = vmul.f32 %v2341_v60, %v2341_v60 }
 0x1f9   :  { %v749_v59 = vadd.f32 %v748_v57, %v718_v56  ;;  %v681_v61 = vadd.f32 %v680_v54, %v2338_v58  ;;  %v719_v62 = vmul.f32 %v2338_v58, %v2338_v58 }
 0x1fb   :  { %v682_v0 = vadd.f32 %v681_v61, %v2332_v51  ;;  %v750_v2 = vadd.f32 %v749_v59, %v719_v62  ;;  %v1872_v3 = vpop.f32.mrb[20].mxu1 }
 0x1fc   :  { %v618_v5 = vpop.f32.mrb[21].mxu1  ;;  %v2356_v13 = vadd.f32 %v1872_v3, %v2230_v25 }
 0x1fd   :  { %v751_v7 = vadd.f32 %v750_v2, %v720_v63  ;;  %v2352_v8 = vadd.f32 %v2230_v25, %v618_v5  ;;  %v683_v10 = vadd.f32 %v682_v0, %v2341_v60  ;;  %v1873_v12 = vpop.f32.mrb[22].mxu1 }
 0x1fe   :  { %v621_v14 = vpop.f32.mrb[23].mxu1  ;;  %v2365_v32 = vadd.f32 %v1873_v12, %v2230_v25  ;;  %v724_v24 = vmul.f32 %v2356_v13, %v2356_v13 }
 0x1ff   :  { %v684_v15 = vadd.f32 %v683_v10, %v2352_v8  ;;  %v722_v16 = vmul.f32 %v2352_v8, %v2352_v8  ;;  %v752_v17 = vadd.f32 %v751_v7, %v721_v6  ;;  %v2362_v18 = vadd.f32 %v2230_v25, %v621_v14 }
 0x200   :  { %v725_v37 = vmul.f32 %v2365_v32, %v2365_v32 }
 0x201   :  { %v753_v19 = vadd.f32 %v752_v17, %v722_v16  ;;  %v685_v21 = vadd.f32 %v684_v15, %v2362_v18  ;;  %v723_v22 = vmul.f32 %v2362_v18, %v2362_v18 }
 0x203   :  { %v686_v26 = vadd.f32 %v685_v21, %v2356_v13  ;;  %v754_v27 = vadd.f32 %v753_v19, %v723_v22  ;;  %v1876_v29 = vpop.f32.mrb[24].mxu1 }
 0x204   :  { %v634_v34 = vpop.f32.mrb[25].mxu1  ;;  %v2380_v42 = vadd.f32 %v1876_v29, %v2230_v25 }
 0x205   :  { %v755_v38 = vadd.f32 %v754_v27, %v724_v24  ;;  %v2376_v39 = vadd.f32 %v2230_v25, %v634_v34  ;;  %v687_v40 = vadd.f32 %v686_v26, %v2365_v32  ;;  %v1877_v41 = vpop.f32.mrb[26].mxu1 }
 0x206   :  { %v637_v43 = vpop.f32.mrb[27].mxu1  ;;  %v2389_v54 = vadd.f32 %v1877_v41, %v2230_v25  ;;  %v728_v59 = vmul.f32 %v2380_v42, %v2380_v42 }
 0x207   :  { %v688_v44 = vadd.f32 %v687_v40, %v2376_v39  ;;  %v726_v46 = vmul.f32 %v2376_v39, %v2376_v39  ;;  %v756_v49 = vadd.f32 %v755_v38, %v725_v37  ;;  %v2386_v50 = vadd.f32 %v2230_v25, %v637_v43 }
 0x208   :  { %v729_v2 = vmul.f32 %v2389_v54, %v2389_v54 }
 0x209   :  { %v757_v52 = vadd.f32 %v756_v49, %v726_v46  ;;  %v689_v56 = vadd.f32 %v688_v44, %v2386_v50  ;;  %v727_v57 = vmul.f32 %v2386_v50, %v2386_v50 }
 0x20b   :  { %v690_v61 = vadd.f32 %v689_v56, %v2380_v42  ;;  %v758_v62 = vadd.f32 %v757_v52, %v727_v57  ;;  %v1880_v63 = vpop.f32.mrb[28].mxu1 }
 0x20c   :  { %v650_v0 = vpop.f32.mrb[29].mxu1  ;;  %v2404_v10 = vadd.f32 %v1880_v63, %v2230_v25 }
 0x20d   :  { %v759_v3 = vadd.f32 %v758_v62, %v728_v59  ;;  %v2400_v5 = vadd.f32 %v2230_v25, %v650_v0  ;;  %v691_v6 = vadd.f32 %v690_v61, %v2389_v54  ;;  %v1881_v7 = vpop.f32.mrb[30].mxu1 }
 0x20e   :  { %v653_v12 = vpop.f32.mrb[31].mxu1  ;;  %v2411_v21 = vadd.f32 %v1881_v7, %v2230_v25  ;;  %v732_v26 = vmul.f32 %v2404_v10, %v2404_v10 }
 0x20f   :  { %v692_v14 = vadd.f32 %v691_v6, %v2400_v5  ;;  %v730_v15 = vmul.f32 %v2400_v5, %v2400_v5  ;;  %v760_v16 = vadd.f32 %v759_v3, %v729_v2  ;;  %v654_v17 = vadd.f32 %v2230_v25, %v653_v12 }
 0x210   :  { %v733_v34 = vmul.f32 %v2411_v21, %v2411_v21  ;;  %v782_v12 = vlaneseq }
 0x211   :  { %v761_v19 = vadd.f32 %v760_v16, %v730_v15  ;;  %v693_v22 = vadd.f32 %v692_v14, %v654_v17  ;;  %v731_v24 = vmul.f32 %v654_v17, %v654_v17  ;;  %v434_v15 = vld [vmem:[%s2973_s5 + $0x2] sm:$0x1] }
 0x212   :  { %v783_v14 = vshrl.u32 %v782_v12, 7 }
 0x213   :  { %v694_v27 = vadd.f32 %v693_v22, %v2404_v10  ;;  %v762_v29 = vadd.f32 %v761_v19, %v731_v24  ;;  %v435_v24 = vld [vmem:[%s2973_s5 + $0x3] sm:$0x1] }
 0x214   :  { %v2422_v16 = vsub.s32 0, %v783_v14 }
 0x215   :  { %v695_v37 = vadd.f32 %v694_v27, %v2411_v21  ;;  %v763_v38 = vadd.f32 %v762_v29, %v732_v26 }
 0x217   :  { %v696_v40 = vrot.slane %v695_v37, 4  ;;  %v764_v41 = vadd.f32 %v763_v38, %v733_v34 }
 0x219   :  { %v697_v43 = vadd.f32 %v696_v40, %v695_v37  ;;  %v765_v44 = vrot.slane %v764_v41, 4 }
 0x21b   :  { %v698_v25 = vrot.slane %v697_v43, 2  ;;  %v766_v46 = vadd.f32 %v765_v44, %v764_v41 }
 0x21d   :  { %v699_v49 = vadd.f32 %v698_v25, %v697_v43  ;;  %v767_v52 = vrot.slane %v766_v46, 2 }
 0x21f   :  { %v700_v56 = vrot.slane %v699_v49, 1  ;;  %v768_v57 = vadd.f32 %v767_v52, %v766_v46 }
 0x221   :  { %v701_v59 = vadd.f32 %v700_v56, %v699_v49  ;;  %v769_v61 = vrot.slane %v768_v57, 1 }
 0x223   :  { %v770_v62 = vadd.f32 %v769_v61, %v768_v57  ;;  %v772_v63 = vmul.f32 0.00390625, %v701_v59 }
 0x225   :  { %v773_v0 = vmul.f32 0.00390625, %v770_v62  ;;  %v774_v2 = vmul.f32 %v772_v63, %v772_v63 }
 0x227   :  { %v775_v3 = vsub.f32 %v773_v0, %v774_v2 }
 0x229   :  { %v776_v6 = vmax.f32 %v775_v3, 0.0 }
 0x22b   :  { %v777_v7 = vadd.f32 1e-05, %v776_v6 }
 0x22d   :  { %2026 = vrsqrt.f32 %v777_v7 }
 0x237   :  { %v2027_v19 = vpop.eup %2026 }
 0x238   :  { %v779_v22 = vmul.f32 %v2027_v19, %v434_v15 }
 0x23a   :  { %v780_v26 = vmul.f32 %v779_v22, %v772_v63  ;;  %v785_v27 = vrot.slane %v779_v22, %v2422_v16 }
 0x23c   :  { %v781_v29 = vsub.f32 %v435_v24, %v780_v26  ;;  %v2428_v34 = vmul.f32 %v785_v27, %v654_v17  ;;  %v786_v37 = vmul.f32 %v785_v27, %v2233_v28  ;;  %v787_v38 = vmul.f32 %v785_v27, %v2239_v33 }
 0x23d   :  { %v788_v40 = vmul.f32 %v785_v27, %v2236_v31  ;;  %v789_v41 = vmul.f32 %v785_v27, %v2244_v35  ;;  %v790_v43 = vmul.f32 %v785_v27, %v2256_v45  ;;  %v791_v44 = vmul.f32 %v785_v27, %v2266_v53 }
 0x23e   :  { %v2437_v25 = vrot.slane %v781_v29, %v2422_v16  ;;  %v792_v46 = vmul.f32 %v785_v27, %v2260_v48  ;;  %v793_v17 = vmul.f32 %v785_v27, %v2269_v55  ;;  %v794_v49 = vmul.f32 %v785_v27, %v2280_v1 }
 0x23f   :  { %v795_v28 = vmul.f32 %v785_v27, %v2290_v9  ;;  %v796_v33 = vmul.f32 %v785_v27, %v2284_v4  ;;  %v797_v31 = vmul.f32 %v785_v27, %v2293_v11  ;;  %v798_v35 = vmul.f32 %v785_v27, %v2304_v20 }
 0x240   :  { %v799_v45 = vmul.f32 %v785_v27, %v2314_v30  ;;  %v800_v53 = vmul.f32 %v785_v27, %v2308_v23  ;;  %v801_v52 = vmul.f32 %v785_v27, %v2317_v36  ;;  %v802_v48 = vmul.f32 %v785_v27, %v2328_v47 }
 0x241   :  { %v803_v55 = vmul.f32 %v785_v27, %v2338_v58  ;;  %v804_v1 = vmul.f32 %v785_v27, %v2332_v51  ;;  %v805_v9 = vmul.f32 %v785_v27, %v2341_v60  ;;  %v806_v4 = vmul.f32 %v785_v27, %v2352_v8 }
 0x242   :  { %v807_v11 = vmul.f32 %v785_v27, %v2362_v18  ;;  %v808_v20 = vmul.f32 %v785_v27, %v2356_v13  ;;  %v2457_v30 = vmul.f32 %v785_v27, %v2365_v32  ;;  %v2460_v23 = vmul.f32 %v785_v27, %v2376_v39 }
 0x243   :  { %v2463_v36 = vmul.f32 %v785_v27, %v2386_v50  ;;  %v2466_v47 = vmul.f32 %v785_v27, %v2380_v42  ;;  %v2469_v51 = vmul.f32 %v785_v27, %v2389_v54  ;;  %v2472_v58 = vmul.f32 %v785_v27, %v2400_v5 }
 0x244   :  { %v2475_v60 = vmul.f32 %v785_v27, %v2404_v10  ;;  %v2478_v8 = vmul.f32 %v785_v27, %v2411_v21  ;;  %v824_v13 = vadd.f32 %v2437_v25, %v788_v40  ;;  %v825_v18 = vadd.f32 %v2437_v25, %v789_v41 }
 0x245   :  { %v822_v32 = vadd.f32 %v2437_v25, %v786_v37  ;;  %v823_v39 = vadd.f32 %v2437_v25, %v787_v38  ;;  %v826_v42 = vadd.f32 %v2437_v25, %v790_v43  ;;  %v827_v50 = vadd.f32 %v2437_v25, %v791_v44 }
 0x246   :  { %v856_v54 = vmax.f32 %v824_v13, 0.0  ;;  %v857_v5 = vmax.f32 %v825_v18, 0.0  ;;  %v828_v10 = vadd.f32 %v2437_v25, %v792_v46  ;;  %v829_v56 = vadd.f32 %v2437_v25, %v793_v17 }
 0x247   :  { %v854_v21 = vmax.f32 %v822_v32, 0.0  ;;  %v855_v57 = vmax.f32 %v823_v39, 0.0  ;;  %v858_v59 = vmax.f32 %v826_v42, 0.0  ;;  %v859_v61 = vmax.f32 %v827_v50, 0.0 }
 0x248   :  { %v887_v62 = vpack.c.bf16 %v857_v5, %v856_v54  ;;  %v860_v63 = vmax.f32 %v828_v10, 0.0  ;;  %v861_v0 = vmax.f32 %v829_v56, 0.0  ;;  %v830_v2 = vadd.f32 %v2437_v25, %v794_v49 }
 0x249   :  { %v886_v3 = vpack.c.bf16 %v855_v57, %v854_v21  ;;  %v888_v6 = vpack.c.bf16 %v859_v61, %v858_v59  ;;  %v831_v7 = vadd.f32 %v2437_v25, %v795_v28  ;;  %v832_v12 = vadd.f32 %v2437_v25, %v796_v33 }
 0x24a   :  { %v889_v14 = vpack.c.bf16 %v861_v0, %v860_v63  ;;  %v862_v15 = vmax.f32 %v830_v2, 0.0  ;;  %v833_v19 = vadd.f32 %v2437_v25, %v797_v31  ;;  %v834_v22 = vadd.f32 %v2437_v25, %v798_v35 }
 0x24b   :  { %1898 = vmatprep.mubr.bf16.mxu0 %v886_v3  ;;  %v863_v24 = vmax.f32 %v831_v7, 0.0  ;;  %v864_v26 = vmax.f32 %v832_v12, 0.0  ;;  %v835_v27 = vadd.f32 %v2437_v25, %v799_v45  ;;  %v836_v29 = vadd.f32 %v2437_v25, %v800_v53  ;;  %v2022_v12 = vld [vmem:[%s2975_s4 + $0x20] sm:$0xff]  }
 0x24c   :  { %1899 = vmatmul.mubr.bf16.vlgmr.msra.gmra.mrb[32].mxu0 %v887_v62  ;;  %v865_v37 = vmax.f32 %v833_v19, 0.0  ;;  %v866_v38 = vmax.f32 %v834_v22, 0.0  ;;  %v837_v40 = vadd.f32 %v2437_v25, %v801_v52  ;;  %v838_v41 = vadd.f32 %v2437_v25, %v802_v48  ;;  %v2025_v19 = vld [vmem:[%s2975_s4 + $0x38] sm:$0xff]   ;;  %v2548_v22 = vld [vmem:[%s2973_s5 + $0x4] ss:$0 sm:$0xff] }
 0x24d   :  { %1902 = vmatprep.mubr.bf16.mxu0 %v888_v6  ;;  %v890_v43 = vpack.c.bf16 %v863_v24, %v862_v15  ;;  %v867_v44 = vmax.f32 %v835_v27, 0.0  ;;  %v868_v46 = vmax.f32 %v836_v29, 0.0  ;;  %v839_v17 = vadd.f32 %v2437_v25, %v803_v55  ;;  %v2024_v15 = vld [vmem:[%s2975_s4 + $0x30] sm:$0xff]  }
 0x24e   :  { %v891_v49 = vpack.c.bf16 %v865_v37, %v864_v26  ;;  %v869_v28 = vmax.f32 %v837_v40, 0.0  ;;  %v870_v33 = vmax.f32 %v838_v41, 0.0  ;;  %v840_v31 = vadd.f32 %v2437_v25, %v804_v1 }
 0x24f   :  { %v892_v35 = vpack.c.bf16 %v867_v44, %v866_v38  ;;  %v871_v45 = vmax.f32 %v839_v17, 0.0  ;;  %v841_v53 = vadd.f32 %v2437_v25, %v805_v9  ;;  %v842_v13 = vadd.f32 %v2437_v25, %v806_v4 }
 0x250   :  { %v893_v52 = vpack.c.bf16 %v869_v28, %v868_v46  ;;  %v872_v18 = vmax.f32 %v840_v31, 0.0  ;;  %v843_v48 = vadd.f32 %v2437_v25, %v807_v11  ;;  %v844_v32 = vadd.f32 %v2437_v25, %v808_v20 }
 0x251   :  { %v894_v39 = vpack.c.bf16 %v871_v45, %v870_v33  ;;  %v873_v42 = vmax.f32 %v841_v53, 0.0  ;;  %v874_v55 = vmax.f32 %v842_v13, 0.0  ;;  %v845_v50 = vadd.f32 %v2437_v25, %v2457_v30 }
 0x252   :  { %v875_v54 = vmax.f32 %v843_v48, 0.0  ;;  %v876_v1 = vmax.f32 %v844_v32, 0.0  ;;  %v846_v5 = vadd.f32 %v2437_v25, %v2460_v23  ;;  %v847_v9 = vadd.f32 %v2437_v25, %v2463_v36 }
 0x253   :  { %v895_v4 = vpack.c.bf16 %v873_v42, %v872_v18  ;;  %v877_v10 = vmax.f32 %v845_v50, 0.0  ;;  %v848_v11 = vadd.f32 %v2437_v25, %v2466_v47  ;;  %v849_v20 = vadd.f32 %v2437_v25, %v2469_v51 }
 0x254   :  { %1903 = vmatmul.mubr.bf16.gmra.mrb[36].mxu0 %v889_v14  ;;  %v896_v56 = vpack.c.bf16 %v875_v54, %v874_v55  ;;  %v878_v21 = vmax.f32 %v846_v5, 0.0  ;;  %v879_v30 = vmax.f32 %v847_v9, 0.0  ;;  %v850_v57 = vadd.f32 %v2437_v25, %v2472_v58  ;;  %v2023_v14 = vld [vmem:[%s2975_s4 + $0x28] sm:$0xff]  }
 0x255   :  { %1906 = vmatprep.mubr.bf16.mxu0 %v890_v43  ;;  %v897_v23 = vpack.c.bf16 %v877_v10, %v876_v1  ;;  %v880_v59 = vmax.f32 %v848_v11, 0.0  ;;  %v881_v61 = vmax.f32 %v849_v20, 0.0  ;;  %v851_v36 = vadd.f32 %v2437_v25, %v2428_v34  ;;  %v2018_v34 = vld [vmem:[%s2975_s4] sm:$0xff]  }
 0x256   :  { %v898_v62 = vpack.c.bf16 %v879_v30, %v878_v21  ;;  %v882_v63 = vmax.f32 %v850_v57, 0.0  ;;  %v852_v47 = vadd.f32 %v2437_v25, %v2475_v60  ;;  %v853_v51 = vadd.f32 %v2437_v25, %v2478_v8  ;;  %1930 = vmatprep.subr.bf16.mxu1 %v2018_v34  ;;  %v2019_v25 = vld [vmem:[%s2975_s4 + $0x8] sm:$0xff]   ;;  %v2020_v60 = vld [vmem:[%s2975_s4 + $0x10] sm:$0xff]   ;;  %v2021_v8 = vld [vmem:[%s2975_s4 + $0x18] sm:$0xff]  }
 0x257   :  { %v899_v0 = vpack.c.bf16 %v881_v61, %v880_v59  ;;  %v883_v2 = vmax.f32 %v851_v36, 0.0  ;;  %1931 = vmatpush3.bf16.msra.mxu1 %v2018_v34 }
 0x258   :  { %v884_v3 = vmax.f32 %v852_v47, 0.0  ;;  %v885_v6 = vmax.f32 %v853_v51, 0.0  ;;  %1932 = vmatprep.subr.bf16.mxu1 %v2019_v25 }
 0x259   :  { %v900_v58 = vpack.c.bf16 %v883_v2, %v882_v63 }
 0x25a   :  { %v901_v7 = vpack.c.bf16 %v885_v6, %v884_v3 }
 0x25b   :  { %1933 = vmatpush3.bf16.msra.mxu1 %v2019_v25 }
 0x25c   :  { %1907 = vmatmul.mubr.bf16.gmra.mrb[40].mxu0 %v891_v49  ;;  %1934 = vmatprep.subr.bf16.mxu1 %v2020_v60 }
 0x25d   :  { %1910 = vmatprep.mubr.bf16.mxu0 %v892_v35 }
 0x25f   :  { %1935 = vmatpush3.bf16.msra.mxu1 %v2020_v60 }
 0x260   :  { %1936 = vmatprep.subr.bf16.mxu1 %v2021_v8 }
 0x263   :  { %1937 = vmatpush3.bf16.msra.mxu1 %v2021_v8 }
 0x264   :  { %1911 = vmatmul.mubr.bf16.gmra.mrb[44].mxu0 %v893_v52  ;;  %1938 = vmatprep.subr.bf16.mxu1 %v2022_v12 }
 0x265   :  { %1914 = vmatprep.mubr.bf16.mxu0 %v894_v39 }
 0x267   :  { %1939 = vmatpush3.bf16.msra.mxu1 %v2022_v12 }
 0x268   :  { %1940 = vmatprep.subr.bf16.mxu1 %v2023_v14 }
 0x26b   :  { %1941 = vmatpush3.bf16.msra.mxu1 %v2023_v14 }
 0x26c   :  { %1915 = vmatmul.mubr.bf16.gmra.mrb[48].mxu0 %v895_v4  ;;  %1942 = vmatprep.subr.bf16.mxu1 %v2024_v15 }
 0x26d   :  { %1918 = vmatprep.mubr.bf16.mxu0 %v896_v56 }
 0x26f   :  { %1943 = vmatpush3.bf16.msra.mxu1 %v2024_v15 }
 0x270   :  { %1944 = vmatprep.subr.bf16.mxu1 %v2025_v19 }
 0x273   :  { %1945 = vmatpush3.bf16.msra.mxu1 %v2025_v19 }
 0x274   :  { %1919 = vmatmul.mubr.bf16.gmra.mrb[52].mxu0 %v897_v23 }
 0x275   :  { %1922 = vmatprep.mubr.bf16.mxu0 %v898_v62 }
 0x27c   :  { %1923 = vmatmul.mubr.bf16.gmra.mrb[56].mxu0 %v899_v0 }
 0x27d   :  { %1926 = vmatprep.mubr.bf16.mxu0 %v900_v58 }
 0x284   :  { %1927 = vmatmul.mubr.bf16.gmra.mrb[60].mxu0 %v901_v7 }
 0x31f   :  { %v1900_v24 = vpop.f32.mrb[32].mxu0 }
 0x320   :  { %v1007_v26 = vpop.f32.mrb[33].mxu0  ;;  %v2554_v38 = vadd.f32 %v1900_v24, %v2548_v22 }
 0x321   :  { %v2551_v27 = vadd.f32 %v2548_v22, %v1007_v26  ;;  %v1901_v29 = vpop.f32.mrb[34].mxu0 }
 0x322   :  { %v1010_v37 = vpop.f32.mrb[35].mxu0  ;;  %v2562_v43 = vadd.f32 %v1901_v29, %v2548_v22  ;;  %v1173_v17 = vmul.f32 %v2554_v38, %v2554_v38 }
 0x323   :  { %v2557_v40 = vadd.f32 %v2548_v22, %v1010_v37  ;;  %v1171_v41 = vmul.f32 %v2551_v27, %v2551_v27 }
 0x324   :  { %v1174_v35 = vmul.f32 %v2562_v43, %v2562_v43 }
 0x325   :  { %v1134_v44 = vadd.f32 %v2557_v40, %v2551_v27  ;;  %v1172_v46 = vmul.f32 %v2557_v40, %v2557_v40 }
 0x327   :  { %v1135_v49 = vadd.f32 %v1134_v44, %v2554_v38  ;;  %v1203_v28 = vadd.f32 %v1172_v46, %v1171_v41  ;;  %v1904_v33 = vpop.f32.mrb[36].mxu0 }
 0x328   :  { %v1023_v31 = vpop.f32.mrb[37].mxu0  ;;  %v2578_v18 = vadd.f32 %v1904_v33, %v2548_v22 }
 0x329   :  { %v1204_v45 = vadd.f32 %v1203_v28, %v1173_v17  ;;  %v2574_v53 = vadd.f32 %v2548_v22, %v1023_v31  ;;  %v1136_v13 = vadd.f32 %v1135_v49, %v2562_v43  ;;  %v1905_v52 = vpop.f32.mrb[38].mxu0 }
 0x32a   :  { %v1026_v48 = vpop.f32.mrb[39].mxu0  ;;  %v2587_v54 = vadd.f32 %v1905_v52, %v2548_v22  ;;  %v1177_v9 = vmul.f32 %v2578_v18, %v2578_v18 }
 0x32b   :  { %v1137_v32 = vadd.f32 %v1136_v13, %v2574_v53  ;;  %v1175_v39 = vmul.f32 %v2574_v53, %v2574_v53  ;;  %v1205_v42 = vadd.f32 %v1204_v45, %v1174_v35  ;;  %v2584_v55 = vadd.f32 %v2548_v22, %v1026_v48 }
 0x32c   :  { %v1178_v56 = vmul.f32 %v2587_v54, %v2587_v54 }
 0x32d   :  { %v1206_v50 = vadd.f32 %v1205_v42, %v1175_v39  ;;  %v1138_v1 = vadd.f32 %v1137_v32, %v2584_v55  ;;  %v1176_v5 = vmul.f32 %v2584_v55, %v2584_v55 }
 0x32f   :  { %v1139_v4 = vadd.f32 %v1138_v1, %v2578_v18  ;;  %v1207_v10 = vadd.f32 %v1206_v50, %v1176_v5  ;;  %v1908_v11 = vpop.f32.mrb[40].mxu0 }
 0x330   :  { %v1039_v20 = vpop.f32.mrb[41].mxu0  ;;  %v2602_v59 = vadd.f32 %v1908_v11, %v2548_v22 }
 0x331   :  { %v1208_v21 = vadd.f32 %v1207_v10, %v1177_v9  ;;  %v2598_v30 = vadd.f32 %v2548_v22, %v1039_v20  ;;  %v1140_v57 = vadd.f32 %v1139_v4, %v2587_v54  ;;  %v1909_v23 = vpop.f32.mrb[42].mxu0 }
 0x332   :  { %v1042_v61 = vpop.f32.mrb[43].mxu0  ;;  %v2611_v0 = vadd.f32 %v1909_v23, %v2548_v22  ;;  %v1181_v6 = vmul.f32 %v2602_v59, %v2602_v59 }
 0x333   :  { %v1141_v36 = vadd.f32 %v1140_v57, %v2598_v30  ;;  %v1179_v62 = vmul.f32 %v2598_v30, %v2598_v30  ;;  %v1209_v63 = vadd.f32 %v1208_v21, %v1178_v56  ;;  %v2608_v47 = vadd.f32 %v2548_v22, %v1042_v61 }
 0x334   :  { %v1182_v60 = vmul.f32 %v2611_v0, %v2611_v0 }
 0x335   :  { %v1210_v51 = vadd.f32 %v1209_v63, %v1179_v62  ;;  %v1142_v2 = vadd.f32 %v1141_v36, %v2608_v47  ;;  %v1180_v3 = vmul.f32 %v2608_v47, %v2608_v47 }
 0x337   :  { %v1143_v58 = vadd.f32 %v1142_v2, %v2602_v59  ;;  %v1211_v7 = vadd.f32 %v1210_v51, %v1180_v3  ;;  %v1912_v34 = vpop.f32.mrb[44].mxu0 }
 0x338   :  { %v1055_v25 = vpop.f32.mrb[45].mxu0  ;;  %v2626_v19 = vadd.f32 %v1912_v34, %v2548_v22 }
 0x339   :  { %v1212_v8 = vadd.f32 %v1211_v7, %v1181_v6  ;;  %v2622_v12 = vadd.f32 %v2548_v22, %v1055_v25  ;;  %v1144_v14 = vadd.f32 %v1143_v58, %v2611_v0  ;;  %v1913_v15 = vpop.f32.mrb[46].mxu0 }
 0x33a   :  { %v1058_v24 = vpop.f32.mrb[47].mxu0  ;;  %v2635_v46 = vadd.f32 %v1913_v15, %v2548_v22  ;;  %v1185_v28 = vmul.f32 %v2626_v19, %v2626_v19 }
 0x33b   :  { %v1145_v26 = vadd.f32 %v1144_v14, %v2622_v12  ;;  %v1183_v29 = vmul.f32 %v2622_v12, %v2622_v12  ;;  %v1213_v37 = vadd.f32 %v1212_v8, %v1182_v60  ;;  %v2632_v41 = vadd.f32 %v2548_v22, %v1058_v24 }
 0x33c   :  { %v1186_v13 = vmul.f32 %v2635_v46, %v2635_v46 }
 0x33d   :  { %v1214_v44 = vadd.f32 %v1213_v37, %v1183_v29  ;;  %v1146_v17 = vadd.f32 %v1145_v26, %v2632_v41  ;;  %v1184_v49 = vmul.f32 %v2632_v41, %v2632_v41 }
 0x33f   :  { %v1147_v33 = vadd.f32 %v1146_v17, %v2626_v19  ;;  %v1215_v31 = vadd.f32 %v1214_v44, %v1184_v49  ;;  %v1916_v35 = vpop.f32.mrb[48].mxu0 }
 0x340   :  { %v1071_v45 = vpop.f32.mrb[49].mxu0  ;;  %v2650_v42 = vadd.f32 %v1916_v35, %v2548_v22 }
 0x341   :  { %v1216_v52 = vadd.f32 %v1215_v31, %v1185_v28  ;;  %v2646_v48 = vadd.f32 %v2548_v22, %v1071_v45  ;;  %v1148_v32 = vadd.f32 %v1147_v33, %v2635_v46  ;;  %v1917_v39 = vpop.f32.mrb[50].mxu0 }
 0x342   :  { %v1074_v50 = vpop.f32.mrb[51].mxu0  ;;  %v2659_v11 = vadd.f32 %v1917_v39, %v2548_v22  ;;  %v1189_v21 = vmul.f32 %v2650_v42, %v2650_v42 }
 0x343   :  { %v1149_v1 = vadd.f32 %v1148_v32, %v2646_v48  ;;  %v1187_v5 = vmul.f32 %v2646_v48, %v2646_v48  ;;  %v1217_v9 = vadd.f32 %v1216_v52, %v1186_v13  ;;  %v2656_v4 = vadd.f32 %v2548_v22, %v1074_v50 }
 0x344   :  { %v1190_v62 = vmul.f32 %v2659_v11, %v2659_v11 }
 0x345   :  { %v1218_v10 = vadd.f32 %v1217_v9, %v1187_v5  ;;  %v1150_v20 = vadd.f32 %v1149_v1, %v2656_v4  ;;  %v1188_v56 = vmul.f32 %v2656_v4, %v2656_v4 }
 0x347   :  { %v1151_v57 = vadd.f32 %v1150_v20, %v2650_v42  ;;  %v1219_v23 = vadd.f32 %v1218_v10, %v1188_v56  ;;  %v1920_v61 = vpop.f32.mrb[52].mxu0 }
 0x348   :  { %v1087_v36 = vpop.f32.mrb[53].mxu0  ;;  %v2674_v6 = vadd.f32 %v1920_v61, %v2548_v22 }
 0x349   :  { %v1220_v63 = vadd.f32 %v1219_v23, %v1189_v21  ;;  %v2670_v51 = vadd.f32 %v2548_v22, %v1087_v36  ;;  %v1152_v2 = vadd.f32 %v1151_v57, %v2659_v11  ;;  %v1921_v3 = vpop.f32.mrb[54].mxu0 }
 0x34a   :  { %v1090_v58 = vpop.f32.mrb[55].mxu0  ;;  %v2683_v14 = vadd.f32 %v1921_v3, %v2548_v22  ;;  %v1193_v26 = vmul.f32 %v2674_v6, %v2674_v6 }
 0x34b   :  { %v1153_v7 = vadd.f32 %v1152_v2, %v2670_v51  ;;  %v1191_v34 = vmul.f32 %v2670_v51, %v2670_v51  ;;  %v1221_v25 = vadd.f32 %v1220_v63, %v1190_v62  ;;  %v2680_v60 = vadd.f32 %v2548_v22, %v1090_v58 }
 0x34c   :  { %v1194_v49 = vmul.f32 %v2683_v14, %v2683_v14 }
 0x34d   :  { %v1222_v8 = vadd.f32 %v1221_v25, %v1191_v34  ;;  %v1154_v15 = vadd.f32 %v1153_v7, %v2680_v60  ;;  %v1192_v24 = vmul.f32 %v2680_v60, %v2680_v60 }
 0x34f   :  { %v1155_v29 = vadd.f32 %v1154_v15, %v2674_v6  ;;  %v1223_v37 = vadd.f32 %v1222_v8, %v1192_v24  ;;  %v1924_v44 = vpop.f32.mrb[56].mxu0 }
 0x350   :  { %v1103_v17 = vpop.f32.mrb[57].mxu0  ;;  %v2698_v45 = vadd.f32 %v1924_v44, %v2548_v22 }
 0x351   :  { %v1224_v28 = vadd.f32 %v1223_v37, %v1193_v26  ;;  %v2694_v33 = vadd.f32 %v2548_v22, %v1103_v17  ;;  %v1156_v31 = vadd.f32 %v1155_v29, %v2683_v14  ;;  %v1925_v35 = vpop.f32.mrb[58].mxu0 }
 0x352   :  { %v1106_v13 = vpop.f32.mrb[59].mxu0  ;;  %v2707_v5 = vadd.f32 %v1925_v35, %v2548_v22  ;;  %v1197_v20 = vmul.f32 %v2698_v45, %v2698_v45 }
 0x353   :  { %v1157_v52 = vadd.f32 %v1156_v31, %v2694_v33  ;;  %v1195_v32 = vmul.f32 %v2694_v33, %v2694_v33  ;;  %v1225_v39 = vadd.f32 %v1224_v28, %v1194_v49  ;;  %v2704_v50 = vadd.f32 %v2548_v22, %v1106_v13 }
 0x354   :  { %v1198_v61 = vmul.f32 %v2707_v5, %v2707_v5 }
 0x355   :  { %v1226_v1 = vadd.f32 %v1225_v39, %v1195_v32  ;;  %v1158_v9 = vadd.f32 %v1157_v52, %v2704_v50  ;;  %v1196_v10 = vmul.f32 %v2704_v50, %v2704_v50 }
 0x357   :  { %v1159_v56 = vadd.f32 %v1158_v9, %v2698_v45  ;;  %v1227_v21 = vadd.f32 %v1226_v1, %v1196_v10  ;;  %v1928_v57 = vpop.f32.mrb[60].mxu0 }
 0x358   :  { %v1119_v23 = vpop.f32.mrb[61].mxu0  ;;  %v2722_v3 = vadd.f32 %v1928_v57, %v2548_v22 }
 0x359   :  { %v1228_v36 = vadd.f32 %v1227_v21, %v1197_v20  ;;  %v2718_v62 = vadd.f32 %v2548_v22, %v1119_v23  ;;  %v1160_v63 = vadd.f32 %v1159_v56, %v2707_v5  ;;  %v1929_v2 = vpop.f32.mrb[62].mxu0 }
 0x35a   :  { %v1122_v58 = vpop.f32.mrb[63].mxu0  ;;  %v2729_v24 = vadd.f32 %v1929_v2, %v2548_v22  ;;  %v1201_v37 = vmul.f32 %v2722_v3, %v2722_v3 }
 0x35b   :  { %v1161_v7 = vadd.f32 %v1160_v63, %v2718_v62  ;;  %v1199_v34 = vmul.f32 %v2718_v62, %v2718_v62  ;;  %v1229_v25 = vadd.f32 %v1228_v36, %v1198_v61  ;;  %v1123_v8 = vadd.f32 %v2548_v22, %v1122_v58 }
 0x35c   :  { %v1202_v49 = vmul.f32 %v2729_v24, %v2729_v24 }
 0x35d   :  { %v1230_v15 = vadd.f32 %v1229_v25, %v1199_v34  ;;  %v1162_v26 = vadd.f32 %v1161_v7, %v1123_v8  ;;  %v1200_v29 = vmul.f32 %v1123_v8, %v1123_v8  ;;  %v903_v7 = vld [vmem:[%s2973_s5 + $0x5] sm:$0x1] }
 0x35f   :  { %v1163_v44 = vadd.f32 %v1162_v26, %v2722_v3  ;;  %v1231_v17 = vadd.f32 %v1230_v15, %v1200_v29  ;;  %v904_v15 = vld [vmem:[%s2973_s5 + $0x6] sm:$0x1] }
 0x361   :  { %v1164_v28 = vadd.f32 %v1163_v44, %v2729_v24  ;;  %v1232_v31 = vadd.f32 %v1231_v17, %v1201_v37 }
 0x363   :  { %v1165_v35 = vrot.slane %v1164_v28, 4  ;;  %v1233_v13 = vadd.f32 %v1232_v31, %v1202_v49 }
 0x365   :  { %v1166_v52 = vadd.f32 %v1165_v35, %v1164_v28  ;;  %v1234_v32 = vrot.slane %v1233_v13, 4 }
 0x367   :  { %v1167_v22 = vrot.slane %v1166_v52, 2  ;;  %v1235_v39 = vadd.f32 %v1234_v32, %v1233_v13 }
 0x369   :  { %v1168_v1 = vadd.f32 %v1167_v22, %v1166_v52  ;;  %v1236_v9 = vrot.slane %v1235_v39, 2 }
 0x36b   :  { %v1169_v10 = vrot.slane %v1168_v1, 1  ;;  %v1237_v20 = vadd.f32 %v1236_v9, %v1235_v39 }
 0x36d   :  { %v1170_v56 = vadd.f32 %v1169_v10, %v1168_v1  ;;  %v1238_v21 = vrot.slane %v1237_v20, 1 }
 0x36f   :  { %v1239_v57 = vadd.f32 %v1238_v21, %v1237_v20  ;;  %v1240_v23 = vmul.f32 0.00390625, %v1170_v56 }
 0x371   :  { %v1241_v61 = vmul.f32 0.00390625, %v1239_v57  ;;  %v1242_v36 = vmul.f32 %v1240_v23, %v1240_v23 }
 0x373   :  { %v1243_v63 = vsub.f32 %v1241_v61, %v1242_v36 }
 0x375   :  { %v1244_v2 = vmax.f32 %v1243_v63, 0.0 }
 0x377   :  { %v1245_v58 = vadd.f32 1e-05, %v1244_v2 }
 0x379   :  { %2028 = vrsqrt.f32 %v1245_v58 }
 0x383   :  { %v2029_v34 = vpop.eup %2028 }
 0x384   :  { %v1247_v25 = vmul.f32 %v2029_v34, %v903_v7 }
 0x386   :  { %v1248_v26 = vmul.f32 %v1247_v25, %v1240_v23  ;;  %v1253_v29 = vrot.slane %v1247_v25, %v2422_v16 }
 0x388   :  { %v1249_v37 = vsub.f32 %v904_v15, %v1248_v26  ;;  %v2744_v44 = vmul.f32 %v1253_v29, %v1123_v8  ;;  %v1254_v17 = vmul.f32 %v1253_v29, %v2551_v27  ;;  %v1255_v49 = vmul.f32 %v1253_v29, %v2557_v40 }
 0x389   :  { %v1256_v28 = vmul.f32 %v1253_v29, %v2554_v38  ;;  %v1257_v31 = vmul.f32 %v1253_v29, %v2562_v43  ;;  %v1258_v35 = vmul.f32 %v1253_v29, %v2574_v53  ;;  %v1259_v13 = vmul.f32 %v1253_v29, %v2584_v55 }
 0x38a   :  { %v2753_v52 = vrot.slane %v1249_v37, %v2422_v16  ;;  %v1260_v32 = vmul.f32 %v1253_v29, %v2578_v18  ;;  %v1261_v8 = vmul.f32 %v1253_v29, %v2587_v54  ;;  %v1262_v22 = vmul.f32 %v1253_v29, %v2598_v30 }
 0x38b   :  { %v1263_v27 = vmul.f32 %v1253_v29, %v2608_v47  ;;  %v1264_v40 = vmul.f32 %v1253_v29, %v2602_v59  ;;  %v1265_v38 = vmul.f32 %v1253_v29, %v2611_v0  ;;  %v1266_v43 = vmul.f32 %v1253_v29, %v2622_v12 }
 0x38c   :  { %v1267_v53 = vmul.f32 %v1253_v29, %v2632_v41  ;;  %v1268_v55 = vmul.f32 %v1253_v29, %v2626_v19  ;;  %v1269_v16 = vmul.f32 %v1253_v29, %v2635_v46  ;;  %v1270_v18 = vmul.f32 %v1253_v29, %v2646_v48 }
 0x38d   :  { %v1271_v54 = vmul.f32 %v1253_v29, %v2656_v4  ;;  %v1272_v30 = vmul.f32 %v1253_v29, %v2650_v42  ;;  %v1273_v47 = vmul.f32 %v1253_v29, %v2659_v11  ;;  %v1274_v59 = vmul.f32 %v1253_v29, %v2670_v51 }
 0x38e   :  { %v1275_v0 = vmul.f32 %v1253_v29, %v2680_v60  ;;  %v1276_v12 = vmul.f32 %v1253_v29, %v2674_v6  ;;  %v2773_v41 = vmul.f32 %v1253_v29, %v2683_v14  ;;  %v2776_v19 = vmul.f32 %v1253_v29, %v2694_v33 }
 0x38f   :  { %v2779_v46 = vmul.f32 %v1253_v29, %v2704_v50  ;;  %v2782_v48 = vmul.f32 %v1253_v29, %v2698_v45  ;;  %v2785_v42 = vmul.f32 %v1253_v29, %v2707_v5  ;;  %v2788_v4 = vmul.f32 %v1253_v29, %v2718_v62 }
 0x390   :  { %v2791_v11 = vmul.f32 %v1253_v29, %v2722_v3  ;;  %v2794_v51 = vmul.f32 %v1253_v29, %v2729_v24  ;;  %v1292_v6 = vadd.f32 %v2753_v52, %v1256_v28  ;;  %v1293_v60 = vadd.f32 %v2753_v52, %v1257_v31 }
 0x391   :  { %v1290_v14 = vadd.f32 %v2753_v52, %v1254_v17  ;;  %v1291_v33 = vadd.f32 %v2753_v52, %v1255_v49  ;;  %v1294_v45 = vadd.f32 %v2753_v52, %v1258_v35  ;;  %v1295_v50 = vadd.f32 %v2753_v52, %v1259_v13 }
 0x392   :  { %v1324_v5 = vmax.f32 %v1292_v6, 0.0  ;;  %v1325_v62 = vmax.f32 %v1293_v60, 0.0  ;;  %v1296_v3 = vadd.f32 %v2753_v52, %v1260_v32  ;;  %v1297_v39 = vadd.f32 %v2753_v52, %v1261_v8 }
 0x393   :  { %v1322_v24 = vmax.f32 %v1290_v14, 0.0  ;;  %v1323_v1 = vmax.f32 %v1291_v33, 0.0  ;;  %v1326_v9 = vmax.f32 %v1294_v45, 0.0  ;;  %v1327_v10 = vmax.f32 %v1295_v50, 0.0 }
 0x394   :  { %v1355_v20 = vpack.c.bf16 %v1325_v62, %v1324_v5  ;;  %v1328_v56 = vmax.f32 %v1296_v3, 0.0  ;;  %v1329_v21 = vmax.f32 %v1297_v39, 0.0  ;;  %v1298_v57 = vadd.f32 %v2753_v52, %v1262_v22 }
 0x395   :  { %v1354_v23 = vpack.c.bf16 %v1323_v1, %v1322_v24  ;;  %v1356_v61 = vpack.c.bf16 %v1327_v10, %v1326_v9  ;;  %v1299_v36 = vadd.f32 %v2753_v52, %v1263_v27  ;;  %v1300_v63 = vadd.f32 %v2753_v52, %v1264_v40 }
 0x396   :  { %v1357_v2 = vpack.c.bf16 %v1329_v21, %v1328_v56  ;;  %v1330_v58 = vmax.f32 %v1298_v57, 0.0  ;;  %v1301_v7 = vadd.f32 %v2753_v52, %v1265_v38  ;;  %v1302_v34 = vadd.f32 %v2753_v52, %v1266_v43 }
 0x397   :  { %1946 = vmatprep.mubr.bf16.mxu1 %v1354_v23  ;;  %v1331_v25 = vmax.f32 %v1299_v36, 0.0  ;;  %v1332_v15 = vmax.f32 %v1300_v63, 0.0  ;;  %v1303_v26 = vadd.f32 %v2753_v52, %v1267_v53  ;;  %v1304_v29 = vadd.f32 %v2753_v52, %v1268_v55 }
 0x398   :  { %1947 = vmatmul.mubr.bf16.vlgmr.msra.gmra.mrb[32].mxu1 %v1355_v20  ;;  %v1333_v37 = vmax.f32 %v1301_v7, 0.0  ;;  %v1334_v17 = vmax.f32 %v1302_v34, 0.0  ;;  %v1305_v49 = vadd.f32 %v2753_v52, %v1269_v16  ;;  %v1306_v28 = vadd.f32 %v2753_v52, %v1270_v18 }
 0x399   :  { %1950 = vmatprep.mubr.bf16.mxu1 %v1356_v61  ;;  %v1358_v31 = vpack.c.bf16 %v1331_v25, %v1330_v58  ;;  %v1335_v35 = vmax.f32 %v1303_v26, 0.0  ;;  %v1336_v13 = vmax.f32 %v1304_v29, 0.0  ;;  %v1307_v32 = vadd.f32 %v2753_v52, %v1271_v54 }
 0x39a   :  { %v1359_v8 = vpack.c.bf16 %v1333_v37, %v1332_v15  ;;  %v1337_v22 = vmax.f32 %v1305_v49, 0.0  ;;  %v1338_v27 = vmax.f32 %v1306_v28, 0.0  ;;  %v1308_v40 = vadd.f32 %v2753_v52, %v1272_v30 }
 0x39b   :  { %v1360_v38 = vpack.c.bf16 %v1335_v35, %v1334_v17  ;;  %v1339_v43 = vmax.f32 %v1307_v32, 0.0  ;;  %v1309_v53 = vadd.f32 %v2753_v52, %v1273_v47  ;;  %v1310_v55 = vadd.f32 %v2753_v52, %v1274_v59 }
 0x39c   :  { %v1361_v16 = vpack.c.bf16 %v1337_v22, %v1336_v13  ;;  %v1340_v6 = vmax.f32 %v1308_v40, 0.0  ;;  %v1311_v18 = vadd.f32 %v2753_v52, %v1275_v0  ;;  %v1312_v60 = vadd.f32 %v2753_v52, %v1276_v12 }
 0x39d   :  { %v1362_v14 = vpack.c.bf16 %v1339_v43, %v1338_v27  ;;  %v1341_v33 = vmax.f32 %v1309_v53, 0.0  ;;  %v1342_v54 = vmax.f32 %v1310_v55, 0.0  ;;  %v1313_v45 = vadd.f32 %v2753_v52, %v2773_v41 }
 0x39e   :  { %v1343_v50 = vmax.f32 %v1311_v18, 0.0  ;;  %v1344_v30 = vmax.f32 %v1312_v60, 0.0  ;;  %v1314_v5 = vadd.f32 %v2753_v52, %v2776_v19  ;;  %v1315_v47 = vadd.f32 %v2753_v52, %v2779_v46 }
 0x39f   :  { %v1363_v59 = vpack.c.bf16 %v1341_v33, %v1340_v6  ;;  %v1345_v62 = vmax.f32 %v1313_v45, 0.0  ;;  %v1316_v0 = vadd.f32 %v2753_v52, %v2782_v48  ;;  %v1317_v12 = vadd.f32 %v2753_v52, %v2785_v42 }
 0x3a0   :  { %1951 = vmatmul.mubr.bf16.gmra.mrb[36].mxu1 %v1357_v2  ;;  %v1364_v3 = vpack.c.bf16 %v1343_v50, %v1342_v54  ;;  %v1346_v39 = vmax.f32 %v1314_v5, 0.0  ;;  %v1347_v41 = vmax.f32 %v1315_v47, 0.0  ;;  %v1318_v24 = vadd.f32 %v2753_v52, %v2788_v4 }
 0x3a1   :  { %1954 = vmatprep.mubr.bf16.mxu1 %v1358_v31  ;;  %v1365_v19 = vpack.c.bf16 %v1345_v62, %v1344_v30  ;;  %v1348_v1 = vmax.f32 %v1316_v0, 0.0  ;;  %v1349_v9 = vmax.f32 %v1317_v12, 0.0  ;;  %v1319_v46 = vadd.f32 %v2753_v52, %v2744_v44  ;;  %v2840_v44 = vld [vmem:[%s2976_s6] ss:$0 sm:$0xff] }
 0x3a2   :  { %v1366_v10 = vpack.c.bf16 %v1347_v41, %v1346_v39  ;;  %v1350_v20 = vmax.f32 %v1318_v24, 0.0  ;;  %v1320_v48 = vadd.f32 %v2753_v52, %v2791_v11  ;;  %v1321_v42 = vadd.f32 %v2753_v52, %v2794_v51 }
 0x3a3   :  { %v1367_v56 = vpack.c.bf16 %v1349_v9, %v1348_v1  ;;  %v1351_v21 = vmax.f32 %v1319_v46, 0.0 }
 0x3a4   :  { %v1352_v57 = vmax.f32 %v1320_v48, 0.0  ;;  %v1353_v23 = vmax.f32 %v1321_v42, 0.0 }
 0x3a5   :  { %v1368_v4 = vpack.c.bf16 %v1351_v21, %v1350_v20 }
 0x3a6   :  { %v1369_v61 = vpack.c.bf16 %v1353_v23, %v1352_v57 }
 0x3a8   :  { %1955 = vmatmul.mubr.bf16.gmra.mrb[40].mxu1 %v1359_v8 }
 0x3a9   :  { %1958 = vmatprep.mubr.bf16.mxu1 %v1360_v38 }
 0x3b0   :  { %1959 = vmatmul.mubr.bf16.gmra.mrb[44].mxu1 %v1361_v16 }
 0x3b1   :  { %1962 = vmatprep.mubr.bf16.mxu1 %v1362_v14 }
 0x3b8   :  { %1963 = vmatmul.mubr.bf16.gmra.mrb[48].mxu1 %v1363_v59 }
 0x3b9   :  { %1966 = vmatprep.mubr.bf16.mxu1 %v1364_v3 }
 0x3c0   :  { %1967 = vmatmul.mubr.bf16.gmra.mrb[52].mxu1 %v1365_v19 }
 0x3c1   :  { %1970 = vmatprep.mubr.bf16.mxu1 %v1366_v10 }
 0x3c8   :  { %1971 = vmatmul.mubr.bf16.gmra.mrb[56].mxu1 %v1367_v56 }
 0x3c9   :  { %1974 = vmatprep.mubr.bf16.mxu1 %v1368_v4 }
 0x3d0   :  { %1975 = vmatmul.mubr.bf16.gmra.mrb[60].mxu1 %v1369_v61 }
 0x46b   :  { %v1948_v52 = vpop.f32.mrb[32].mxu1 }
 0x46c   :  { %v1484_v11 = vadd.f32 %v1948_v52, %v2840_v44  ;;  %v1475_v51 = vpop.f32.mrb[33].mxu1 }
 0x46d   :  { %v1476_v36 = vadd.f32 %v2840_v44, %v1475_v51  ;;  %v1949_v63 = vpop.f32.mrb[34].mxu1 }
 0x46e   :  { %1604 = vst [vmem:[%s2977_s7 + $0x10] sm:$0xff] %v1484_v11  ;;  %v1487_v2 = vadd.f32 %v1949_v63, %v2840_v44  ;;  %v1478_v58 = vpop.f32.mrb[35].mxu1 }
 0x46f   :  { %1602 = vst [vmem:[%s2977_s7] sm:$0xff] %v1476_v36  ;;  %v1479_v7 = vadd.f32 %v2840_v44, %v1478_v58 }
 0x470   :  { %1605 = vst [vmem:[%s2977_s7 + $0x18] sm:$0xff] %v1487_v2 }
 0x471   :  { %1603 = vst [vmem:[%s2977_s7 + $0x8] sm:$0xff] %v1479_v7 }
 0x473   :  { %v1952_v34 = vpop.f32.mrb[36].mxu1 }
 0x474   :  { %v1500_v25 = vadd.f32 %v1952_v34, %v2840_v44  ;;  %v1491_v15 = vpop.f32.mrb[37].mxu1 }
 0x475   :  { %v1492_v26 = vadd.f32 %v2840_v44, %v1491_v15  ;;  %v1953_v29 = vpop.f32.mrb[38].mxu1 }
 0x476   :  { %1608 = vst [vmem:[%s2977_s7 + $0x30] sm:$0xff] %v1500_v25  ;;  %v1503_v37 = vadd.f32 %v1953_v29, %v2840_v44  ;;  %v1494_v17 = vpop.f32.mrb[39].mxu1 }
 0x477   :  { %1606 = vst [vmem:[%s2977_s7 + $0x20] sm:$0xff] %v1492_v26  ;;  %v1495_v49 = vadd.f32 %v2840_v44, %v1494_v17 }
 0x478   :  { %1609 = vst [vmem:[%s2977_s7 + $0x38] sm:$0xff] %v1503_v37 }
 0x479   :  { %1607 = vst [vmem:[%s2977_s7 + $0x28] sm:$0xff] %v1495_v49 }
 0x47b   :  { %v1956_v28 = vpop.f32.mrb[40].mxu1 }
 0x47c   :  { %v1516_v31 = vadd.f32 %v1956_v28, %v2840_v44  ;;  %v1507_v35 = vpop.f32.mrb[41].mxu1 }
 0x47d   :  { %v1508_v13 = vadd.f32 %v2840_v44, %v1507_v35  ;;  %v1957_v32 = vpop.f32.mrb[42].mxu1 }
 0x47e   :  { %1612 = vst [vmem:[%s2977_s7 + $0x50] sm:$0xff] %v1516_v31  ;;  %v1519_v8 = vadd.f32 %v1957_v32, %v2840_v44  ;;  %v1510_v22 = vpop.f32.mrb[43].mxu1 }
 0x47f   :  { %1610 = vst [vmem:[%s2977_s7 + $0x40] sm:$0xff] %v1508_v13  ;;  %v1511_v27 = vadd.f32 %v2840_v44, %v1510_v22 }
 0x480   :  { %1613 = vst [vmem:[%s2977_s7 + $0x58] sm:$0xff] %v1519_v8 }
 0x481   :  { %1611 = vst [vmem:[%s2977_s7 + $0x48] sm:$0xff] %v1511_v27 }
 0x483   :  { %v1960_v40 = vpop.f32.mrb[44].mxu1 }
 0x484   :  { %v1532_v38 = vadd.f32 %v1960_v40, %v2840_v44  ;;  %v1523_v43 = vpop.f32.mrb[45].mxu1 }
 0x485   :  { %v1524_v53 = vadd.f32 %v2840_v44, %v1523_v43  ;;  %v1961_v55 = vpop.f32.mrb[46].mxu1 }
 0x486   :  { %1616 = vst [vmem:[%s2977_s7 + $0x70] sm:$0xff] %v1532_v38  ;;  %v1535_v16 = vadd.f32 %v1961_v55, %v2840_v44  ;;  %v1526_v6 = vpop.f32.mrb[47].mxu1 }
 0x487   :  { %1614 = vst [vmem:[%s2977_s7 + $0x60] sm:$0xff] %v1524_v53  ;;  %v1527_v18 = vadd.f32 %v2840_v44, %v1526_v6 }
 0x488   :  { %1617 = vst [vmem:[%s2977_s7 + $0x78] sm:$0xff] %v1535_v16 }
 0x489   :  { %1615 = vst [vmem:[%s2977_s7 + $0x68] sm:$0xff] %v1527_v18 }
 0x48b   :  { %v1964_v60 = vpop.f32.mrb[48].mxu1 }
 0x48c   :  { %v1548_v14 = vadd.f32 %v1964_v60, %v2840_v44  ;;  %v1539_v33 = vpop.f32.mrb[49].mxu1 }
 0x48d   :  { %v1540_v54 = vadd.f32 %v2840_v44, %v1539_v33  ;;  %v1965_v45 = vpop.f32.mrb[50].mxu1 }
 0x48e   :  { %1620 = vst [vmem:[%s2977_s7 + $0x90] sm:$0xff] %v1548_v14  ;;  %v1551_v50 = vadd.f32 %v1965_v45, %v2840_v44  ;;  %v1542_v30 = vpop.f32.mrb[51].mxu1 }
 0x48f   :  { %1618 = vst [vmem:[%s2977_s7 + $0x80] sm:$0xff] %v1540_v54  ;;  %v1543_v5 = vadd.f32 %v2840_v44, %v1542_v30 }
 0x490   :  { %1621 = vst [vmem:[%s2977_s7 + $0x98] sm:$0xff] %v1551_v50 }
 0x491   :  { %1619 = vst [vmem:[%s2977_s7 + $0x88] sm:$0xff] %v1543_v5 }
 0x493   :  { %v1968_v47 = vpop.f32.mrb[52].mxu1 }
 0x494   :  { %v1564_v59 = vadd.f32 %v1968_v47, %v2840_v44  ;;  %v1555_v62 = vpop.f32.mrb[53].mxu1 }
 0x495   :  { %v1556_v0 = vadd.f32 %v2840_v44, %v1555_v62  ;;  %v1969_v12 = vpop.f32.mrb[54].mxu1 }
 0x496   :  { %1624 = vst [vmem:[%s2977_s7 + $0xb0] sm:$0xff] %v1564_v59  ;;  %v1567_v3 = vadd.f32 %v1969_v12, %v2840_v44  ;;  %v1558_v39 = vpop.f32.mrb[55].mxu1 }
 0x497   :  { %1622 = vst [vmem:[%s2977_s7 + $0xa0] sm:$0xff] %v1556_v0  ;;  %v1559_v41 = vadd.f32 %v2840_v44, %v1558_v39 }
 0x498   :  { %1625 = vst [vmem:[%s2977_s7 + $0xb8] sm:$0xff] %v1567_v3 }
 0x499   :  { %1623 = vst [vmem:[%s2977_s7 + $0xa8] sm:$0xff] %v1559_v41 }
 0x49b   :  { %v1972_v24 = vpop.f32.mrb[56].mxu1 }
 0x49c   :  { %v1580_v19 = vadd.f32 %v1972_v24, %v2840_v44  ;;  %v1571_v1 = vpop.f32.mrb[57].mxu1 }
 0x49d   :  { %v1572_v9 = vadd.f32 %v2840_v44, %v1571_v1  ;;  %v1973_v46 = vpop.f32.mrb[58].mxu1 }
 0x49e   :  { %1628 = vst [vmem:[%s2977_s7 + $0xd0] sm:$0xff] %v1580_v19  ;;  %v1583_v10 = vadd.f32 %v1973_v46, %v2840_v44  ;;  %v1574_v20 = vpop.f32.mrb[59].mxu1 }
 0x49f   :  { %1626 = vst [vmem:[%s2977_s7 + $0xc0] sm:$0xff] %v1572_v9  ;;  %v1575_v48 = vadd.f32 %v2840_v44, %v1574_v20 }
 0x4a0   :  { %1629 = vst [vmem:[%s2977_s7 + $0xd8] sm:$0xff] %v1583_v10 }
 0x4a1   :  { %1627 = vst [vmem:[%s2977_s7 + $0xc8] sm:$0xff] %v1575_v48 }
 0x4a3   :  { %v1976_v42 = vpop.f32.mrb[60].mxu1 }
 0x4a4   :  { %v1596_v56 = vadd.f32 %v1976_v42, %v2840_v44  ;;  %v1587_v21 = vpop.f32.mrb[61].mxu1 }
 0x4a5   :  { %v1588_v57 = vadd.f32 %v2840_v44, %v1587_v21  ;;  %v1977_v23 = vpop.f32.mrb[62].mxu1 }
 0x4a6   :  { %1632 = vst [vmem:[%s2977_s7 + $0xf0] sm:$0xff] %v1596_v56  ;;  %v1599_v4 = vadd.f32 %v1977_v23, %v2840_v44  ;;  %v1590_v61 = vpop.f32.mrb[63].mxu1 }
 0x4a7   :  { %1630 = vst [vmem:[%s2977_s7 + $0xe0] sm:$0xff] %v1588_v57  ;;  %v1591_v52 = vadd.f32 %v2840_v44, %v1590_v61 }
 0x4a8   :  { %1633 = vst [vmem:[%s2977_s7 + $0xf8] sm:$0xff] %v1599_v4 }
 0x4a9   :  { %1631 = vst [vmem:[%s2977_s7 + $0xe8] sm:$0xff] %v1591_v52 }

</bundles_post_ra>
